<compile_context>
chip_gen: v7x
topology: tpu7x:2x2x1
jax: 0.10.0
libtpu: 0.0.40
codegen_flags: <defaults>
</compile_context>

<pallas_src>
import functools
import math

import numpy as np
import jax
import jax.numpy as jnp
from jax.experimental import pallas as pl
from jax.experimental.pallas import tpu as pltpu


def _round_up(x, m):
    return (x + m - 1) // m * m


@functools.lru_cache(maxsize=1)
def _vmem_budget_bytes():
    # v5e/v6e: 128 MiB physical -> ~96 MiB budget; v7x: 64 MiB -> ~48 MiB.
    try:
        cap = int(pltpu.get_tpu_info().vmem_capacity_bytes)
    except Exception:
        cap = 64 * 1024 * 1024
    return max(32 * 1024 * 1024, min(cap * 3 // 4, 96 * 1024 * 1024))


# ---------------------------------------------------------------------------
# Pass 1: direct NHWC conv (kh x kw shifted matmuls) + per-channel partial
#         batch statistics.  Grid = (core_split[parallel], row_block, kh).
# ---------------------------------------------------------------------------
def _conv_stats_kernel(x_ref, w_ref, mask_ref, y_ref, sum_ref, sq_ref, acc_ref):
    # x_ref:    (R, Cin)         bf16  flattened (rows * padded_W) pixels, row ki
    # w_ref:    (kw, Cin, Coutp) bf16  weight slices for kernel row ki
    # mask_ref: (1, R)           f32   1.0 at valid conv-output positions
    # y_ref:    (R, Coutp)       bf16  conv output (padded-W layout)
    # sum_ref:  (8, Coutp)       f32   per-core partial sums (row 0 used)
    # sq_ref:   (8, Coutp)       f32   per-core partial sum-of-squares
    # acc_ref:  (R, Coutp)       f32   conv accumulator across the kh grid axis
    hb = pl.program_id(1)
    ki = pl.program_id(2)
    kw = w_ref.shape[0]
    r = acc_ref.shape[0]
    l = r - kw + 1  # windows starting in the last kw-1 rows would run off the block

    @pl.when(jnp.logical_and(hb == 0, ki == 0))
    def _():
        sum_ref[...] = jnp.zeros_like(sum_ref)
        sq_ref[...] = jnp.zeros_like(sq_ref)

    @pl.when(ki == 0)
    def _():
        acc_ref[...] = jnp.zeros_like(acc_ref)

    # kh*kw decomposition: for kernel row ki (grid axis) and column kj
    # (unrolled), one (l, Cin) x (Cin, Coutp) matmul over the shifted block.
    for kj in range(kw):
        acc_ref[pl.ds(0, l), :] += jnp.dot(
            x_ref[pl.ds(kj, l), :], w_ref[kj],
            preferred_element_type=jnp.float32)

    @pl.when(ki == pl.num_programs(2) - 1)
    def _():
        y = acc_ref[...]
        y_ref[...] = y.astype(y_ref.dtype)
        # Masked per-channel sum / sum-of-squares as (1,R) x (R,Coutp) MXU
        # matmuls; the mask zeroes padded-W / row-straddle garbage positions.
        m = mask_ref[...]
        sum_ref[pl.ds(0, 1), :] += jnp.dot(m, y, preferred_element_type=jnp.float32)
        sq_ref[pl.ds(0, 1), :] += jnp.dot(m, y * y, preferred_element_type=jnp.float32)


# ---------------------------------------------------------------------------
# Pass 2: element-wise BatchNorm (single FMA) + ReLU, in place over y.
# ---------------------------------------------------------------------------
def _bn_relu_kernel(y_ref, scale_ref, shift_ref, o_ref):
    y = y_ref[...].astype(jnp.float32)
    o_ref[...] = jnp.maximum(y * scale_ref[...] + shift_ref[...], 0.0
                             ).astype(o_ref.dtype)


def _conv_bn_relu_nhwc(x_nchw, weight, gamma, beta, *, stride, padding, eps,
                       num_core_splits):
    n, cin, h, w = x_nchw.shape
    cout, cin_w, kh, kw = weight.shape
    assert cin == cin_w
    hp, wp = h + 2 * padding, w + 2 * padding
    ho = (hp - kh) // stride + 1
    wo = (wp - kw) // stride + 1
    assert ho >= 1 and wo >= 1
    cout_p = _round_up(cout, 128)
    m_h = n * ho

    # ---- row-block sizing from the per-generation VMEM budget ---------------
    budget = _vmem_budget_bytes()
    fixed = 4 * kw * cin * cout_p + 128 * cout_p + (1 << 16)
    per_row = 4 * cin + 8 * cout_p + 8          # x(2xbf16) + y(2xbf16) + acc(f32) + mask
    r_max = max(wp, (int(budget * 0.8) - fixed) // per_row)
    g = 8 // math.gcd(wp, 8)                    # (th*wp) % 8 == 0  <=>  th % g == 0
    th_cap = _round_up(-(-m_h // num_core_splits), g)
    th = min(max(g, (r_max // wp) // g * g), th_cap)
    blocks = -(-m_h // th)
    grid_h = -(-blocks // num_core_splits)
    m_h_p = num_core_splits * grid_h * th       # padded (N*Ho), zero rows
    r = th * wp                                 # flattened rows per block
    mwp = m_h_p * wp
    n_blocks = num_core_splits * grid_h
    vmem_limit = int(budget)

    # ---- wrapper-side prep: NHWC bf16 + kh pre-shifted row slabs -------------
    x_nhwc = x_nchw.astype(jnp.bfloat16).transpose(0, 2, 3, 1)
    xp = jnp.pad(x_nhwc, ((0, 0), (padding, padding), (padding, padding), (0, 0)))
    rows = [xp[:, ki:ki + stride * (ho - 1) + 1:stride, :, :] for ki in range(kh)]
    x_rows = jnp.stack(rows, axis=0).reshape(kh, m_h, wp, cin)
    x_rows = jnp.pad(x_rows, ((0, 0), (0, m_h_p - m_h), (0, 0), (0, 0)))
    x_rows = x_rows.reshape(kh, mwp, cin)

    w4 = jnp.transpose(weight, (2, 3, 1, 0)).astype(jnp.float32)       # (kh,kw,Cin,Cout)
    w4 = jnp.pad(w4, ((0, 0), (0, 0), (0, 0), (0, cout_p - cout))).astype(jnp.bfloat16)

    # Valid-output-position mask (identical for every row block).
    col = np.arange(r) % wp
    mask_np = ((col % stride == 0) & (col <= (wo - 1) * stride)).astype(np.float32)
    mask = jnp.asarray(mask_np.reshape(1, r))

    # ---- pass 1: conv + partial stats ---------------------------------------
    y, psum, psq = pl.pallas_call(
        _conv_stats_kernel,
        out_shape=(
            jax.ShapeDtypeStruct((mwp, cout_p), jnp.bfloat16),
            jax.ShapeDtypeStruct((num_core_splits, 8, cout_p), jnp.float32),
            jax.ShapeDtypeStruct((num_core_splits, 8, cout_p), jnp.float32),
        ),
        grid_spec=pltpu.PrefetchScalarGridSpec(
            num_scalar_prefetch=0,
            grid=(num_core_splits, grid_h, kh),
            in_specs=[
                pl.BlockSpec((None, r, cin),
                             lambda c, hb, ki: (ki, c * grid_h + hb, 0)),
                pl.BlockSpec((None, kw, cin, cout_p),
                             lambda c, hb, ki: (ki, 0, 0, 0)),
                pl.BlockSpec((1, r), lambda c, hb, ki: (0, 0)),
            ],
            out_specs=(
                pl.BlockSpec((r, cout_p), lambda c, hb, ki: (c * grid_h + hb, 0)),
                pl.BlockSpec((None, 8, cout_p), lambda c, hb, ki: (c, 0, 0)),
                pl.BlockSpec((None, 8, cout_p), lambda c, hb, ki: (c, 0, 0)),
            ),
            scratch_shapes=[pltpu.VMEM((r, cout_p), jnp.float32)],
        ),
        compiler_params=pltpu.CompilerParams(
            dimension_semantics=("parallel", "arbitrary", "arbitrary"),
            vmem_limit_bytes=vmem_limit),
        cost_estimate=pl.CostEstimate(
            flops=2 * n_blocks * kh * kw * (r - kw + 1) * cin * cout_p
                  + 5 * n_blocks * r * cout_p,
            transcendentals=0,
            bytes_accessed=kh * mwp * cin * 2 + mwp * cout_p * 2
                           + kh * kw * cin * cout_p * 2),
    )(x_rows, w4, mask)

    # ---- tiny XLA glue: combine per-core partial sums -> fused scale/shift ---
    cnt = float(n * ho * wo)
    s1 = jnp.sum(psum, axis=(0, 1))
    s2 = jnp.sum(psq, axis=(0, 1))
    mean = s1 / cnt
    var = jnp.maximum(s2 / cnt - mean * mean, 0.0)
    gamma_p = jnp.pad(gamma.astype(jnp.float32), (0, cout_p - cout))
    beta_p = jnp.pad(beta.astype(jnp.float32), (0, cout_p - cout))
    scale_v = gamma_p * jax.lax.rsqrt(var + eps)
    shift_v = beta_p - mean * scale_v
    scale = scale_v.reshape(1, cout_p)
    shift = shift_v.reshape(1, cout_p)

    # ---- pass 2: element-wise BN FMA + ReLU, in place over y -----------------
    out_flat = pl.pallas_call(
        _bn_relu_kernel,
        out_shape=jax.ShapeDtypeStruct((mwp, cout_p), jnp.bfloat16),
        grid_spec=pltpu.PrefetchScalarGridSpec(
            num_scalar_prefetch=0,
            grid=(n_blocks,),
            in_specs=[
                pl.BlockSpec((r, cout_p), lambda i: (i, 0)),
                pl.BlockSpec((1, cout_p), lambda i: (0, 0)),
                pl.BlockSpec((1, cout_p), lambda i: (0, 0)),
            ],
            out_specs=pl.BlockSpec((r, cout_p), lambda i: (i, 0)),
        ),
        compiler_params=pltpu.CompilerParams(
            dimension_semantics=("parallel",),
            vmem_limit_bytes=vmem_limit),
        input_output_aliases={0: 0},
        cost_estimate=pl.CostEstimate(
            flops=3 * mwp * cout_p,
            transcendentals=0,
            bytes_accessed=2 * mwp * cout_p * 2 + 2 * cout_p * 4),
    )(y, scale, shift)

    # Extract the valid (stride-subsampled) W positions and real channels: NHWC.
    o = out_flat[:m_h * wp, :].reshape(n, ho, wp, cout_p)
    o = o[:, :, 0:(wo - 1) * stride + 1:stride, :cout]
    return o  # (N, Ho, Wo, Cout), bf16


@functools.partial(jax.jit, static_argnames=("stride", "padding", "eps",
                                             "out_dtype", "return_nchw",
                                             "num_core_splits"))
def basic_conv2d(x_nchw, weight, gamma, beta, *, stride, padding, eps=1e-5,
                 out_dtype=jnp.float32, return_nchw=True, num_core_splits=2):
    """x_nchw: (N, Cin, H, W); weight: (Cout, Cin, kh, kw) [PyTorch layouts].

    Set return_nchw=False / out_dtype=jnp.bfloat16 for the zero-extra-copy
    NHWC/bf16 fast path when the consumer accepts it.
    """
    o = _conv_bn_relu_nhwc(x_nchw, weight, gamma, beta, stride=stride,
                           padding=padding, eps=float(eps),
                           num_core_splits=num_core_splits)
    if return_nchw:
        o = jnp.transpose(o, (0, 3, 1, 2))
    return o.astype(out_dtype)


def _reference(x, weight, gamma, beta, *, stride, padding, eps=1e-5):
    y = jax.lax.conv_general_dilated(
        x, weight,
        window_strides=(stride, stride),
        padding=[(padding, padding), (padding, padding)],
        dimension_numbers=("NCHW", "OIHW", "NCHW"))
    mean = jnp.mean(y, axis=(0, 2, 3), keepdims=True)
    var = jnp.mean((y - mean) ** 2, axis=(0, 2, 3), keepdims=True)
    y = (y - mean) * jax.lax.rsqrt(var + eps)
    y = y * gamma.reshape(1, -1, 1, 1) + beta.reshape(1, -1, 1, 1)
    return jnp.maximum(y, 0.0)


if __name__ == "__main__":
    key = jax.random.PRNGKey(0)
    k1, k2, k3, k4 = jax.random.split(key, 4)

    # --- Test 1: BasicConv2d(4, 8, kernel_size=3, stride=1, padding=1) ------
    N, Cin, H, W = 2, 4, 16, 16
    Cout, ksz, stride, padding = 8, 3, 1, 1
    x = jax.random.normal(k1, (N, Cin, H, W), dtype=jnp.float32)
    weight = jax.random.normal(k2, (Cout, Cin, ksz, ksz), dtype=jnp.float32) * 0.1
    gamma = jnp.ones((Cout,), dtype=jnp.float32)   # BatchNorm2d default affine init
    beta = jnp.zeros((Cout,), dtype=jnp.float32)

    out = basic_conv2d(x, weight, gamma, beta, stride=stride, padding=padding)
    out = jax.block_until_ready(out)
    assert out.shape == (N, Cout, H, W)
    assert out.dtype == jnp.float32
    assert bool(jnp.all(jnp.isfinite(out)))

    # Reference with conv inputs rounded to bf16, like the MXU feed.
    ref_bf = _reference(x.astype(jnp.bfloat16).astype(jnp.float32),
                        weight.astype(jnp.bfloat16).astype(jnp.float32),
                        gamma, beta, stride=stride, padding=padding)
    err1 = float(jnp.max(jnp.abs(out - ref_bf)))
    assert jnp.allclose(out, ref_bf, atol=3e-2, rtol=3e-2), err1

    # Looser sanity check vs the full-f32 PyTorch-semantics reference.
    ref32 = _reference(x, weight, gamma, beta, stride=stride, padding=padding)
    assert jnp.allclose(out, ref32, atol=5e-2, rtol=5e-2)

    # --- Test 2: stride=2, padding=0 exercises the strided/W-subsample path --
    N2, C2, H2, W2 = 1, 8, 9, 9
    Co2, k2z, s2, p2 = 16, 3, 2, 0
    x2 = jax.random.normal(k3, (N2, C2, H2, W2), dtype=jnp.float32)
    w2 = jax.random.normal(k4, (Co2, C2, k2z, k2z), dtype=jnp.float32) * 0.1
    g2 = jnp.full((Co2,), 0.8, dtype=jnp.float32)
    b2 = jnp.full((Co2,), 0.1, dtype=jnp.float32)

    out2 = basic_conv2d(x2, w2, g2, b2, stride=s2, padding=p2)
    out2 = jax.block_until_ready(out2)
    ref2 = _reference(x2.astype(jnp.bfloat16).astype(jnp.float32),
                      w2.astype(jnp.bfloat16).astype(jnp.float32),
                      g2, b2, stride=s2, padding=p2)
    assert out2.shape == ref2.shape
    assert bool(jnp.all(jnp.isfinite(out2)))
    err2 = float(jnp.max(jnp.abs(out2 - ref2)))
    assert jnp.allclose(out2, ref2, atol=5e-2, rtol=5e-2), err2

    print("KERNEL_OK")
</pallas_src>

<mosaic_0001>
module attributes {stable_mosaic.version = 11 : i64} {
  func.func @_conv_stats_kernel(%arg0: i32, %arg1: i32, %arg2: i32, %arg3: memref<1x288x4xbf16, #tpu.memory_space<vmem>>, %arg4: memref<1x3x4x128xbf16, #tpu.memory_space<vmem>>, %arg5: memref<1x288xf32, #tpu.memory_space<vmem>>, %arg6: memref<288x128xbf16, #tpu.memory_space<vmem>>, %arg7: memref<1x8x128xf32, #tpu.memory_space<vmem>>, %arg8: memref<1x8x128xf32, #tpu.memory_space<vmem>>, %arg9: memref<288x128xf32, #tpu.memory_space<vmem>>) attributes {dimension_semantics = [#tpu.dimension_semantics<parallel>, #tpu.dimension_semantics<arbitrary>, #tpu.dimension_semantics<arbitrary>], iteration_bounds = array<i64: 2, 1, 3>, scalar_prefetch = 0 : i64, scratch_operands = 1 : i64, tpu.core_type = #tpu.core_type<tc>, window_params = [{transform_indices = @transform_0, window_bounds = array<i64: 1, 288, 4>}, {transform_indices = @transform_1, window_bounds = array<i64: 1, 3, 4, 128>}, {pipeline_mode = #tpu.pipeline_mode<synchronous>, transform_indices = @transform_2, window_bounds = array<i64: 1, 288>}, {transform_indices = @transform_3, window_bounds = array<i64: 288, 128>}, {transform_indices = @transform_4, window_bounds = array<i64: 1, 8, 128>}, {transform_indices = @transform_5, window_bounds = array<i64: 1, 8, 128>}]} {
    %c0_i32 = arith.constant 0 : i32
    %0 = arith.cmpi eq, %arg1, %c0_i32 : i32
    %c0_i32_0 = arith.constant 0 : i32
    %1 = arith.cmpi eq, %arg2, %c0_i32_0 : i32
    %2 = arith.andi %0, %1 : i1
    %3 = arith.extui %2 : i1 to i32
    %c0_i32_1 = arith.constant 0 : i32
    %4 = arith.cmpi ne, %3, %c0_i32_1 : i32
    scf.if %4 {
      %cst_37 = arith.constant 0.000000e+00 : f32
      %35 = vector.broadcast %cst_37 : f32 to vector<8x128xf32>
      %c0_38 = arith.constant 0 : index
      %c0_39 = arith.constant 0 : index
      %c0_40 = arith.constant 0 : index
      %36 = vector.load %arg7[%c0_38, %c0_39, %c0_40] : memref<1x8x128xf32, #tpu.memory_space<vmem>>, vector<1x8x128xf32>
      %37 = vector.shape_cast %36 : vector<1x8x128xf32> to vector<8x128xf32>
      %38 = vector.shape_cast %35 : vector<8x128xf32> to vector<1x8x128xf32>
      tpu.vector_store %arg7[%c0_38, %c0_39, %c0_40], %38 {strides = array<i32>} : memref<1x8x128xf32, #tpu.memory_space<vmem>>, vector<1x8x128xf32>,
      %cst_41 = arith.constant 0.000000e+00 : f32
      %39 = vector.broadcast %cst_41 : f32 to vector<8x128xf32>
      %c0_42 = arith.constant 0 : index
      %c0_43 = arith.constant 0 : index
      %c0_44 = arith.constant 0 : index
      %40 = vector.load %arg8[%c0_42, %c0_43, %c0_44] : memref<1x8x128xf32, #tpu.memory_space<vmem>>, vector<1x8x128xf32>
      %41 = vector.shape_cast %40 : vector<1x8x128xf32> to vector<8x128xf32>
      %42 = vector.shape_cast %39 : vector<8x128xf32> to vector<1x8x128xf32>
      tpu.vector_store %arg8[%c0_42, %c0_43, %c0_44], %42 {strides = array<i32>} : memref<1x8x128xf32, #tpu.memory_space<vmem>>, vector<1x8x128xf32>,
    } else {
    }
    %c0_i32_2 = arith.constant 0 : i32
    %5 = arith.cmpi eq, %arg2, %c0_i32_2 : i32
    %6 = arith.extui %5 : i1 to i32
    %c0_i32_3 = arith.constant 0 : i32
    %7 = arith.cmpi ne, %6, %c0_i32_3 : i32
    scf.if %7 {
      %cst_37 = arith.constant 0.000000e+00 : f32
      %35 = vector.broadcast %cst_37 : f32 to vector<288x128xf32>
      %c0_38 = arith.constant 0 : index
      %c0_39 = arith.constant 0 : index
      %36 = vector.load %arg9[%c0_38, %c0_39] : memref<288x128xf32, #tpu.memory_space<vmem>>, vector<288x128xf32>
      tpu.vector_store %arg9[%c0_38, %c0_39], %35 {strides = array<i32>} : memref<288x128xf32, #tpu.memory_space<vmem>>, vector<288x128xf32>,
    } else {
    }
    %c0 = arith.constant 0 : index
    %c0_4 = arith.constant 0 : index
    %8 = vector.load %arg9[%c0, %c0_4] : memref<288x128xf32, #tpu.memory_space<vmem>>, vector<286x128xf32>
    %c0_5 = arith.constant 0 : index
    %c0_6 = arith.constant 0 : index
    %c0_7 = arith.constant 0 : index
    %9 = vector.load %arg3[%c0_5, %c0_6, %c0_7] : memref<1x288x4xbf16, #tpu.memory_space<vmem>>, vector<1x286x4xbf16>
    %10 = vector.shape_cast %9 : vector<1x286x4xbf16> to vector<286x4xbf16>
    %c0_8 = arith.constant 0 : index
    %c0_9 = arith.constant 0 : index
    %c0_10 = arith.constant 0 : index
    %c0_11 = arith.constant 0 : index
    %11 = vector.load %arg4[%c0_8, %c0_9, %c0_10, %c0_11] : memref<1x3x4x128xbf16, #tpu.memory_space<vmem>>, vector<1x1x4x128xbf16>
    %12 = vector.shape_cast %11 : vector<1x1x4x128xbf16> to vector<4x128xbf16>
    %cst = arith.constant dense<0.000000e+00> : vector<286x128xf32>
    %13 = tpu.matmul %10, %12, %cst {dimension_numbers = #tpu.dot_dimension_numbers<[1], [0], [0], [1], [0, 0, 1, 1], [], []>} : vector<286x4xbf16>, vector<4x128xbf16>, vector<286x128xf32> -> vector<286x128xf32>
    %14 = arith.addf %8, %13 : vector<286x128xf32>
    %c0_12 = arith.constant 0 : index
    %c0_13 = arith.constant 0 : index
    %15 = vector.load %arg9[%c0_12, %c0_13] : memref<288x128xf32, #tpu.memory_space<vmem>>, vector<286x128xf32>
    tpu.vector_store %arg9[%c0_12, %c0_13], %14 {strides = array<i32>} : memref<288x128xf32, #tpu.memory_space<vmem>>, vector<286x128xf32>,
    %c0_14 = arith.constant 0 : index
    %c0_15 = arith.constant 0 : index
    %16 = vector.load %arg9[%c0_14, %c0_15] : memref<288x128xf32, #tpu.memory_space<vmem>>, vector<286x128xf32>
    %c0_16 = arith.constant 0 : index
    %c1 = arith.constant 1 : index
    %c0_17 = arith.constant 0 : index
    %17 = vector.load %arg3[%c0_16, %c1, %c0_17] : memref<1x288x4xbf16, #tpu.memory_space<vmem>>, vector<1x286x4xbf16>
    %18 = vector.shape_cast %17 : vector<1x286x4xbf16> to vector<286x4xbf16>
    %c0_18 = arith.constant 0 : index
    %c1_19 = arith.constant 1 : index
    %c0_20 = arith.constant 0 : index
    %c0_21 = arith.constant 0 : index
    %19 = vector.load %arg4[%c0_18, %c1_19, %c0_20, %c0_21] : memref<1x3x4x128xbf16, #tpu.memory_space<vmem>>, vector<1x1x4x128xbf16>
    %20 = vector.shape_cast %19 : vector<1x1x4x128xbf16> to vector<4x128xbf16>
    %cst_22 = arith.constant dense<0.000000e+00> : vector<286x128xf32>
    %21 = tpu.matmul %18, %20, %cst_22 {dimension_numbers = #tpu.dot_dimension_numbers<[1], [0], [0], [1], [0, 0, 1, 1], [], []>} : vector<286x4xbf16>, vector<4x128xbf16>, vector<286x128xf32> -> vector<286x128xf32>
    %22 = arith.addf %16, %21 : vector<286x128xf32>
    %c0_23 = arith.constant 0 : index
    %c0_24 = arith.constant 0 : index
    %23 = vector.load %arg9[%c0_23, %c0_24] : memref<288x128xf32, #tpu.memory_space<vmem>>, vector<286x128xf32>
    tpu.vector_store %arg9[%c0_23, %c0_24], %22 {strides = array<i32>} : memref<288x128xf32, #tpu.memory_space<vmem>>, vector<286x128xf32>,
    %c0_25 = arith.constant 0 : index
    %c0_26 = arith.constant 0 : index
    %24 = vector.load %arg9[%c0_25, %c0_26] : memref<288x128xf32, #tpu.memory_space<vmem>>, vector<286x128xf32>
    %c0_27 = arith.constant 0 : index
    %c2 = arith.constant 2 : index
    %c0_28 = arith.constant 0 : index
    %25 = vector.load %arg3[%c0_27, %c2, %c0_28] : memref<1x288x4xbf16, #tpu.memory_space<vmem>>, vector<1x286x4xbf16>
    %26 = vector.shape_cast %25 : vector<1x286x4xbf16> to vector<286x4xbf16>
    %c0_29 = arith.constant 0 : index
    %c2_30 = arith.constant 2 : index
    %c0_31 = arith.constant 0 : index
    %c0_32 = arith.constant 0 : index
    %27 = vector.load %arg4[%c0_29, %c2_30, %c0_31, %c0_32] : memref<1x3x4x128xbf16, #tpu.memory_space<vmem>>, vector<1x1x4x128xbf16>
    %28 = vector.shape_cast %27 : vector<1x1x4x128xbf16> to vector<4x128xbf16>
    %cst_33 = arith.constant dense<0.000000e+00> : vector<286x128xf32>
    %29 = tpu.matmul %26, %28, %cst_33 {dimension_numbers = #tpu.dot_dimension_numbers<[1], [0], [0], [1], [0, 0, 1, 1], [], []>} : vector<286x4xbf16>, vector<4x128xbf16>, vector<286x128xf32> -> vector<286x128xf32>
    %30 = arith.addf %24, %29 : vector<286x128xf32>
    %c0_34 = arith.constant 0 : index
    %c0_35 = arith.constant 0 : index
    %31 = vector.load %arg9[%c0_34, %c0_35] : memref<288x128xf32, #tpu.memory_space<vmem>>, vector<286x128xf32>
    tpu.vector_store %arg9[%c0_34, %c0_35], %30 {strides = array<i32>} : memref<288x128xf32, #tpu.memory_space<vmem>>, vector<286x128xf32>,
    %c2_i32 = arith.constant 2 : i32
    %32 = arith.cmpi eq, %arg2, %c2_i32 : i32
    %33 = arith.extui %32 : i1 to i32
    %c0_i32_36 = arith.constant 0 : i32
    %34 = arith.cmpi ne, %33, %c0_i32_36 : i32
    scf.if %34 {
      %c0_37 = arith.constant 0 : index
      %c0_38 = arith.constant 0 : index
      %35 = vector.load %arg9[%c0_37, %c0_38] : memref<288x128xf32, #tpu.memory_space<vmem>>, vector<288x128xf32>
      %36 = arith.truncf %35 : vector<288x128xf32> to vector<288x128xbf16>
      %c0_39 = arith.constant 0 : index
      %c0_40 = arith.constant 0 : index
      %37 = vector.load %arg6[%c0_39, %c0_40] : memref<288x128xbf16, #tpu.memory_space<vmem>>, vector<288x128xbf16>
      tpu.vector_store %arg6[%c0_39, %c0_40], %36 {strides = array<i32>} : memref<288x128xbf16, #tpu.memory_space<vmem>>, vector<288x128xbf16>,
      %c0_41 = arith.constant 0 : index
      %c0_42 = arith.constant 0 : index
      %38 = vector.load %arg5[%c0_41, %c0_42] : memref<1x288xf32, #tpu.memory_space<vmem>>, vector<1x288xf32>
      %c0_43 = arith.constant 0 : index
      %c0_44 = arith.constant 0 : index
      %c0_45 = arith.constant 0 : index
      %39 = vector.load %arg7[%c0_43, %c0_44, %c0_45] : memref<1x8x128xf32, #tpu.memory_space<vmem>>, vector<1x1x128xf32>
      %40 = vector.shape_cast %39 : vector<1x1x128xf32> to vector<1x128xf32>
      %cst_46 = arith.constant dense<0.000000e+00> : vector<1x128xf32>
      %41 = tpu.matmul %38, %35, %cst_46 {dimension_numbers = #tpu.dot_dimension_numbers<[1], [0], [0], [1], [0, 0, 1, 1], [], []>} : vector<1x288xf32>, vector<288x128xf32>, vector<1x128xf32> -> vector<1x128xf32>
      %42 = arith.addf %40, %41 : vector<1x128xf32>
      %c0_47 = arith.constant 0 : index
      %c0_48 = arith.constant 0 : index
      %c0_49 = arith.constant 0 : index
      %43 = vector.load %arg7[%c0_47, %c0_48, %c0_49] : memref<1x8x128xf32, #tpu.memory_space<vmem>>, vector<1x1x128xf32>
      %44 = vector.shape_cast %43 : vector<1x1x128xf32> to vector<1x128xf32>
      %45 = vector.shape_cast %42 : vector<1x128xf32> to vector<1x1x128xf32>
      tpu.vector_store %arg7[%c0_47, %c0_48, %c0_49], %45 {strides = array<i32>} : memref<1x8x128xf32, #tpu.memory_space<vmem>>, vector<1x1x128xf32>,
      %c0_50 = arith.constant 0 : index
      %c0_51 = arith.constant 0 : index
      %c0_52 = arith.constant 0 : index
      %46 = vector.load %arg8[%c0_50, %c0_51, %c0_52] : memref<1x8x128xf32, #tpu.memory_space<vmem>>, vector<1x1x128xf32>
      %47 = vector.shape_cast %46 : vector<1x1x128xf32> to vector<1x128xf32>
      %48 = arith.mulf %35, %35 : vector<288x128xf32>
      %cst_53 = arith.constant dense<0.000000e+00> : vector<1x128xf32>
      %49 = tpu.matmul %38, %48, %cst_53 {dimension_numbers = #tpu.dot_dimension_numbers<[1], [0], [0], [1], [0, 0, 1, 1], [], []>} : vector<1x288xf32>, vector<288x128xf32>, vector<1x128xf32> -> vector<1x128xf32>
      %50 = arith.addf %47, %49 : vector<1x128xf32>
      %c0_54 = arith.constant 0 : index
      %c0_55 = arith.constant 0 : index
      %c0_56 = arith.constant 0 : index
      %51 = vector.load %arg8[%c0_54, %c0_55, %c0_56] : memref<1x8x128xf32, #tpu.memory_space<vmem>>, vector<1x1x128xf32>
      %52 = vector.shape_cast %51 : vector<1x1x128xf32> to vector<1x128xf32>
      %53 = vector.shape_cast %50 : vector<1x128xf32> to vector<1x1x128xf32>
      tpu.vector_store %arg8[%c0_54, %c0_55, %c0_56], %53 {strides = array<i32>} : memref<1x8x128xf32, #tpu.memory_space<vmem>>, vector<1x1x128xf32>,
    } else {
    }
    return
  }
  func.func @transform_0(%arg0: i32, %arg1: i32, %arg2: i32) -> (i32, i32, i32) {
    %c1_i32 = arith.constant 1 : i32
    %0 = arith.muli %arg0, %c1_i32 : i32
    %1 = arith.addi %0, %arg1 : i32
    %c0_i32 = arith.constant 0 : i32
    %c0_i32_0 = arith.constant 0 : i32
    return %arg2, %1, %c0_i32 : i32, i32, i32
  }
  func.func @transform_1(%arg0: i32, %arg1: i32, %arg2: i32) -> (i32, i32, i32, i32) {
    %c0_i32 = arith.constant 0 : i32
    %c0_i32_0 = arith.constant 0 : i32
    %c0_i32_1 = arith.constant 0 : i32
    %c0_i32_2 = arith.constant 0 : i32
    return %arg2, %c0_i32, %c0_i32_0, %c0_i32_1 : i32, i32, i32, i32
  }
  func.func @transform_2(%arg0: i32, %arg1: i32, %arg2: i32) -> (i32, i32) {
    %c0_i32 = arith.constant 0 : i32
    %c0_i32_0 = arith.constant 0 : i32
    %c0_i32_1 = arith.constant 0 : i32
    return %c0_i32, %c0_i32_0 : i32, i32
  }
  func.func @transform_3(%arg0: i32, %arg1: i32, %arg2: i32) -> (i32, i32) {
    %c1_i32 = arith.constant 1 : i32
    %0 = arith.muli %arg0, %c1_i32 : i32
    %1 = arith.addi %0, %arg1 : i32
    %c0_i32 = arith.constant 0 : i32
    %c0_i32_0 = arith.constant 0 : i32
    return %1, %c0_i32 : i32, i32
  }
  func.func @transform_4(%arg0: i32, %arg1: i32, %arg2: i32) -> (i32, i32, i32) {
    %c0_i32 = arith.constant 0 : i32
    %c0_i32_0 = arith.constant 0 : i32
    %c0_i32_1 = arith.constant 0 : i32
    return %arg0, %c0_i32, %c0_i32_0 : i32, i32, i32
  }
  func.func @transform_5(%arg0: i32, %arg1: i32, %arg2: i32) -> (i32, i32, i32) {
    %c0_i32 = arith.constant 0 : i32
    %c0_i32_0 = arith.constant 0 : i32
    %c0_i32_1 = arith.constant 0 : i32
    return %arg0, %c0_i32, %c0_i32_0 : i32, i32, i32
  }
}

module attributes {stable_mosaic.version = 11 : i64} {
  func.func @_bn_relu_kernel(%arg0: i32, %arg1: memref<288x128xbf16, #tpu.memory_space<vmem>>, %arg2: memref<1x128xf32, #tpu.memory_space<vmem>>, %arg3: memref<1x128xf32, #tpu.memory_space<vmem>>, %arg4: memref<288x128xbf16, #tpu.memory_space<vmem>>) attributes {dimension_semantics = [#tpu.dimension_semantics<parallel>], iteration_bounds = array<i64: 2>, scalar_prefetch = 0 : i64, scratch_operands = 0 : i64, tpu.core_type = #tpu.core_type<tc>, window_params = [{transform_indices = @transform_0, window_bounds = array<i64: 288, 128>}, {pipeline_mode = #tpu.pipeline_mode<synchronous>, transform_indices = @transform_1, window_bounds = array<i64: 1, 128>}, {pipeline_mode = #tpu.pipeline_mode<synchronous>, transform_indices = @transform_2, window_bounds = array<i64: 1, 128>}, {transform_indices = @transform_3, window_bounds = array<i64: 288, 128>}]} {
    %c0 = arith.constant 0 : index
    %c0_0 = arith.constant 0 : index
    %0 = vector.load %arg1[%c0, %c0_0] : memref<288x128xbf16, #tpu.memory_space<vmem>>, vector<288x128xbf16>
    %1 = arith.extf %0 : vector<288x128xbf16> to vector<288x128xf32>
    %c0_1 = arith.constant 0 : index
    %c0_2 = arith.constant 0 : index
    %2 = vector.load %arg2[%c0_1, %c0_2] : memref<1x128xf32, #tpu.memory_space<vmem>>, vector<1x128xf32>
    %3 = vector.broadcast %2 : vector<1x128xf32> to vector<288x128xf32>
    %4 = arith.mulf %1, %3 : vector<288x128xf32>
    %c0_3 = arith.constant 0 : index
    %c0_4 = arith.constant 0 : index
    %5 = vector.load %arg3[%c0_3, %c0_4] : memref<1x128xf32, #tpu.memory_space<vmem>>, vector<1x128xf32>
    %6 = vector.broadcast %5 : vector<1x128xf32> to vector<288x128xf32>
    %7 = arith.addf %4, %6 : vector<288x128xf32>
    %cst = arith.constant 0.000000e+00 : f32
    %8 = vector.broadcast %cst : f32 to vector<288x128xf32>
    %9 = arith.maximumf %7, %8 : vector<288x128xf32>
    %10 = arith.truncf %9 : vector<288x128xf32> to vector<288x128xbf16>
    %c0_5 = arith.constant 0 : index
    %c0_6 = arith.constant 0 : index
    %11 = vector.load %arg4[%c0_5, %c0_6] : memref<288x128xbf16, #tpu.memory_space<vmem>>, vector<288x128xbf16>
    tpu.vector_store %arg4[%c0_5, %c0_6], %10 {strides = array<i32>} : memref<288x128xbf16, #tpu.memory_space<vmem>>, vector<288x128xbf16>,
    return
  }
  func.func @transform_0(%arg0: i32) -> (i32, i32) {
    %c0_i32 = arith.constant 0 : i32
    %c0_i32_0 = arith.constant 0 : i32
    return %arg0, %c0_i32 : i32, i32
  }
  func.func @transform_1(%arg0: i32) -> (i32, i32) {
    %c0_i32 = arith.constant 0 : i32
    %c0_i32_0 = arith.constant 0 : i32
    %c0_i32_1 = arith.constant 0 : i32
    return %c0_i32, %c0_i32_0 : i32, i32
  }
  func.func @transform_2(%arg0: i32) -> (i32, i32) {
    %c0_i32 = arith.constant 0 : i32
    %c0_i32_0 = arith.constant 0 : i32
    %c0_i32_1 = arith.constant 0 : i32
    return %c0_i32, %c0_i32_0 : i32, i32
  }
  func.func @transform_3(%arg0: i32) -> (i32, i32) {
    %c0_i32 = arith.constant 0 : i32
    %c0_i32_0 = arith.constant 0 : i32
    return %arg0, %c0_i32 : i32, i32
  }
}

</mosaic_0001>

<bundles_post_ra>
// kernel: basic_conv2d.3
= control target key start
LH: loop header
LB: loop body
LE: loop exit
PB: predicated region body
PF: predicated region fallthrough
CT: control target
= control target key end

     0   :  { %s919_s12 = smov 0   ;;  %s1084_s0 = inlined_call_operand.vmem [shape: bf16[576,128], index: 0, kind: input, shape index: {}, may-alias: {0,3}]   ;;  %s1085_s1 = inlined_call_operand.vmem [shape: f32[1,128], index: 1, kind: input, shape index: {}]   ;;  %s1086_s2 = inlined_call_operand.vmem [shape: f32[1,128], index: 2, kind: input, shape index: {}]   ;;  %s1087_s3 = inlined_call_operand.vmem [shape: bf16[576,128], index: 3, kind: output, shape index: {}, may-alias: {0,3}]  }
   0x1 LB: > { %s604_s13 = sadd.s32 4294967295, %s897_s12   ;;  %p608_p0 = scmp.ge.s32.totalorder %s897_s12, 1  ;;  %s897_s12 = sphi %s919_s12, %s13_s12  }
   0x2   : > { %p138_p1 = scmp.lt.s32.totalorder %s897_s12, 3 }
   0x4   : > { %p139_p2 = pnand %p608_p0, %p138_p1 }
   0x5   : > { %s162_s14 = smul.u32 (!%p139_p2), 36, %s604_s13  ;;  %v611_v46 = vld [vmem:[%s1085_s1] ss:$0 sm:$0xff] (!%p139_p2) }
   0x6   : > { %142 = sbr.rel (%p139_p2) target bundleno = 62 (0x3e), region = 32 }
   0x7   : > { %p163_p3 = scmp.lt.s32.totalorder (!%p139_p2), %s162_s14, 71 }
   0xd   : > { %s1089_s14 = smov (!%p163_p3, %s162_s14), 71 }
   0xe   : > { %s609_s15 = sshll.u32 %s1089_s14, 2 }
   0xf   : > { %s935_s18 = scalar_lea.vmem %s1084_s0, %s609_s15  ;;  %s1014_s25 = scalar_lea.vmem %s1087_s3, %s609_s15 }
  0x10   : > { %v688_v0 = vld [vmem:[%s935_s18] sm:$0xff]   ;;  %v849_v1 = vld [vmem:[%s935_s18 + $0x8] sm:$0xff]   ;;  %v850_v2 = vld [vmem:[%s935_s18 + $0x10] sm:$0xff]  }
  0x11   : > { %v689_v3 = vunpack.c.l.bf16 %v688_v0  ;;  %v690_v4 = vunpack.c.h.bf16 %v688_v0  ;;  %v693_v5 = vunpack.c.l.bf16 %v849_v1  ;;  %v694_v6 = vunpack.c.h.bf16 %v849_v1  ;;  %v851_v7 = vld [vmem:[%s935_s18 + $0x18] sm:$0xff]   ;;  %v852_v8 = vld [vmem:[%s935_s18 + $0x20] sm:$0xff]   ;;  %v853_v9 = vld [vmem:[%s935_s18 + $0x28] sm:$0xff]  }
  0x12   : > { %v697_v10 = vunpack.c.l.bf16 %v850_v2  ;;  %v698_v11 = vunpack.c.h.bf16 %v850_v2  ;;  %v701_v12 = vunpack.c.l.bf16 %v851_v7  ;;  %v702_v13 = vunpack.c.h.bf16 %v851_v7  ;;  %v854_v14 = vld [vmem:[%s935_s18 + $0x30] sm:$0xff]   ;;  %v855_v15 = vld [vmem:[%s935_s18 + $0x38] sm:$0xff]   ;;  %v856_v16 = vld [vmem:[%s935_s18 + $0x40] sm:$0xff]  }
  0x13   : > { %v705_v17 = vunpack.c.l.bf16 %v852_v8  ;;  %v706_v18 = vunpack.c.h.bf16 %v852_v8  ;;  %v709_v19 = vunpack.c.l.bf16 %v853_v9  ;;  %v710_v20 = vunpack.c.h.bf16 %v853_v9  ;;  %v857_v21 = vld [vmem:[%s935_s18 + $0x48] sm:$0xff]   ;;  %v858_v22 = vld [vmem:[%s935_s18 + $0x50] sm:$0xff]   ;;  %v859_v23 = vld [vmem:[%s935_s18 + $0x58] sm:$0xff]  }
  0x14   : > { %v713_v24 = vunpack.c.l.bf16 %v854_v14  ;;  %v714_v25 = vunpack.c.h.bf16 %v854_v14  ;;  %v717_v26 = vunpack.c.l.bf16 %v855_v15  ;;  %v718_v27 = vunpack.c.h.bf16 %v855_v15  ;;  %v860_v28 = vld [vmem:[%s935_s18 + $0x60] sm:$0xff]   ;;  %v861_v29 = vld [vmem:[%s935_s18 + $0x68] sm:$0xff]   ;;  %v862_v34 = vld [vmem:[%s935_s18 + $0x70] sm:$0xff]  }
  0x15   : > { %v721_v30 = vunpack.c.l.bf16 %v856_v16  ;;  %v722_v31 = vunpack.c.h.bf16 %v856_v16  ;;  %v725_v32 = vunpack.c.l.bf16 %v857_v21  ;;  %v726_v33 = vunpack.c.h.bf16 %v857_v21  ;;  %v863_v35 = vld [vmem:[%s935_s18 + $0x78] sm:$0xff]   ;;  %v864_v40 = vld [vmem:[%s935_s18 + $0x80] sm:$0xff]   ;;  %v865_v41 = vld [vmem:[%s935_s18 + $0x88] sm:$0xff]  }
  0x16   : > { %v729_v36 = vunpack.c.l.bf16 %v858_v22  ;;  %v730_v37 = vunpack.c.h.bf16 %v858_v22  ;;  %v733_v38 = vunpack.c.l.bf16 %v859_v23  ;;  %v734_v39 = vunpack.c.h.bf16 %v859_v23 }
  0x17   : > { %v737_v42 = vunpack.c.l.bf16 %v860_v28  ;;  %v738_v43 = vunpack.c.h.bf16 %v860_v28  ;;  %v741_v44 = vunpack.c.l.bf16 %v861_v29  ;;  %v742_v45 = vunpack.c.h.bf16 %v861_v29 }
  0x18   : > { %v745_v47 = vunpack.c.l.bf16 %v862_v34  ;;  %v746_v48 = vunpack.c.h.bf16 %v862_v34  ;;  %v749_v49 = vunpack.c.l.bf16 %v863_v35  ;;  %v750_v50 = vunpack.c.h.bf16 %v863_v35 }
  0x19   : > { %v753_v51 = vunpack.c.l.bf16 %v864_v40  ;;  %v754_v52 = vunpack.c.h.bf16 %v864_v40  ;;  %v757_v53 = vunpack.c.l.bf16 %v865_v41  ;;  %v758_v54 = vunpack.c.h.bf16 %v865_v41 }
  0x1a   : > { %v253_v55 = vmul.f32 %v689_v3, %v611_v46  ;;  %v254_v56 = vmul.f32 %v690_v4, %v611_v46  ;;  %v255_v57 = vmul.f32 %v693_v5, %v611_v46  ;;  %v256_v58 = vmul.f32 %v694_v6, %v611_v46 }
  0x1b   : > { %v257_v59 = vmul.f32 %v697_v10, %v611_v46  ;;  %v258_v60 = vmul.f32 %v698_v11, %v611_v46  ;;  %v259_v61 = vmul.f32 %v701_v12, %v611_v46  ;;  %v260_v62 = vmul.f32 %v702_v13, %v611_v46 }
  0x1c   : > { %v261_v63 = vmul.f32 %v705_v17, %v611_v46  ;;  %v262_v0 = vmul.f32 %v706_v18, %v611_v46  ;;  %v263_v1 = vmul.f32 %v709_v19, %v611_v46  ;;  %v264_v2 = vmul.f32 %v710_v20, %v611_v46  ;;  %v983_v18 = vld [vmem:[%s1086_s2] ss:$0 sm:$0xff] }
  0x1d   : > { %v265_v7 = vmul.f32 %v713_v24, %v611_v46  ;;  %v266_v8 = vmul.f32 %v714_v25, %v611_v46  ;;  %v267_v9 = vmul.f32 %v717_v26, %v611_v46  ;;  %v268_v14 = vmul.f32 %v718_v27, %v611_v46 }
  0x1e   : > { %v269_v15 = vmul.f32 %v721_v30, %v611_v46  ;;  %v958_v16 = vmul.f32 %v722_v31, %v611_v46  ;;  %v960_v21 = vmul.f32 %v725_v32, %v611_v46  ;;  %v962_v3 = vmul.f32 %v726_v33, %v611_v46 }
  0x1f   : > { %v964_v4 = vmul.f32 %v729_v36, %v611_v46  ;;  %v966_v5 = vmul.f32 %v730_v37, %v611_v46  ;;  %v968_v6 = vmul.f32 %v733_v38, %v611_v46  ;;  %v970_v10 = vmul.f32 %v734_v39, %v611_v46 }
  0x20   : > { %v972_v11 = vmul.f32 %v737_v42, %v611_v46  ;;  %v974_v12 = vmul.f32 %v738_v43, %v611_v46  ;;  %v976_v13 = vmul.f32 %v741_v44, %v611_v46  ;;  %v978_v17 = vmul.f32 %v742_v45, %v611_v46 }
  0x21   : > { %v985_v19 = vmul.f32 %v745_v47, %v611_v46  ;;  %v987_v20 = vmul.f32 %v746_v48, %v611_v46  ;;  %v989_v22 = vmul.f32 %v749_v49, %v611_v46  ;;  %v991_v23 = vmul.f32 %v750_v50, %v611_v46 }
  0x22   : > { %v993_v24 = vmul.f32 %v753_v51, %v611_v46  ;;  %v995_v25 = vmul.f32 %v754_v52, %v611_v46  ;;  %v997_v26 = vmul.f32 %v757_v53, %v611_v46  ;;  %v999_v27 = vmul.f32 %v758_v54, %v611_v46 }
  0x23   : > { %v296_v28 = vadd.f32 %v983_v18, %v253_v55  ;;  %v297_v29 = vadd.f32 %v983_v18, %v254_v56  ;;  %v298_v30 = vadd.f32 %v983_v18, %v255_v57  ;;  %v299_v31 = vadd.f32 %v983_v18, %v256_v58 }
  0x24   : > { %v300_v32 = vadd.f32 %v983_v18, %v257_v59  ;;  %v301_v33 = vadd.f32 %v983_v18, %v258_v60  ;;  %v302_v34 = vadd.f32 %v983_v18, %v259_v61  ;;  %v303_v35 = vadd.f32 %v983_v18, %v260_v62 }
  0x25   : > { %v332_v36 = vmax.f32 %v296_v28, 0.0  ;;  %v333_v37 = vmax.f32 %v297_v29, 0.0  ;;  %v334_v38 = vmax.f32 %v298_v30, 0.0  ;;  %v335_v39 = vmax.f32 %v299_v31, 0.0 }
  0x26   : > { %v336_v40 = vmax.f32 %v300_v32, 0.0  ;;  %v337_v41 = vmax.f32 %v301_v33, 0.0  ;;  %v338_v42 = vmax.f32 %v302_v34, 0.0  ;;  %v339_v43 = vmax.f32 %v303_v35, 0.0 }
  0x27   : > { %v762_v44 = vpack.c.bf16 %v333_v37, %v332_v36  ;;  %v767_v45 = vpack.c.bf16 %v335_v39, %v334_v38  ;;  %v304_v46 = vadd.f32 %v983_v18, %v261_v63  ;;  %v305_v47 = vadd.f32 %v983_v18, %v262_v0 }
  0x28   : > { %v772_v48 = vpack.c.bf16 %v337_v41, %v336_v40  ;;  %v777_v49 = vpack.c.bf16 %v339_v43, %v338_v42  ;;  %v306_v50 = vadd.f32 %v983_v18, %v263_v1  ;;  %v307_v51 = vadd.f32 %v983_v18, %v264_v2 }
  0x29   : > { %763 = vst [vmem:[%s1014_s25] sm:$0xff] %v762_v44   ;;  %866 = vst [vmem:[%s1014_s25 + $0x8] sm:$0xff] %v767_v45   ;;  %v340_v52 = vmax.f32 %v304_v46, 0.0  ;;  %v341_v53 = vmax.f32 %v305_v47, 0.0  ;;  %v308_v54 = vadd.f32 %v983_v18, %v265_v7  ;;  %v309_v55 = vadd.f32 %v983_v18, %v266_v8 }
  0x2a   : > { %867 = vst [vmem:[%s1014_s25 + $0x10] sm:$0xff] %v772_v48   ;;  %868 = vst [vmem:[%s1014_s25 + $0x18] sm:$0xff] %v777_v49   ;;  %v342_v56 = vmax.f32 %v306_v50, 0.0  ;;  %v343_v57 = vmax.f32 %v307_v51, 0.0  ;;  %v310_v58 = vadd.f32 %v983_v18, %v267_v9  ;;  %v311_v59 = vadd.f32 %v983_v18, %v268_v14 }
  0x2b   : > { %v782_v60 = vpack.c.bf16 %v341_v53, %v340_v52  ;;  %v344_v61 = vmax.f32 %v308_v54, 0.0  ;;  %v345_v62 = vmax.f32 %v309_v55, 0.0  ;;  %v312_v63 = vadd.f32 %v983_v18, %v269_v15 }
  0x2c   : > { %v787_v0 = vpack.c.bf16 %v343_v57, %v342_v56  ;;  %v346_v1 = vmax.f32 %v310_v58, 0.0  ;;  %v347_v2 = vmax.f32 %v311_v59, 0.0  ;;  %v313_v7 = vadd.f32 %v983_v18, %v958_v16 }
  0x2d   : > { %869 = vst [vmem:[%s1014_s25 + $0x20] sm:$0xff] %v782_v60   ;;  %v792_v8 = vpack.c.bf16 %v345_v62, %v344_v61  ;;  %v348_v28 = vmax.f32 %v312_v63, 0.0  ;;  %v314_v9 = vadd.f32 %v983_v18, %v960_v21  ;;  %v315_v14 = vadd.f32 %v983_v18, %v962_v3 }
  0x2e   : > { %870 = vst [vmem:[%s1014_s25 + $0x28] sm:$0xff] %v787_v0   ;;  %v797_v29 = vpack.c.bf16 %v347_v2, %v346_v1  ;;  %v349_v30 = vmax.f32 %v313_v7, 0.0  ;;  %v316_v15 = vadd.f32 %v983_v18, %v964_v4  ;;  %v317_v16 = vadd.f32 %v983_v18, %v966_v5 }
  0x2f   : > { %871 = vst [vmem:[%s1014_s25 + $0x30] sm:$0xff] %v792_v8   ;;  %v350_v31 = vmax.f32 %v314_v9, 0.0  ;;  %v351_v32 = vmax.f32 %v315_v14, 0.0  ;;  %v318_v33 = vadd.f32 %v983_v18, %v968_v6  ;;  %v319_v21 = vadd.f32 %v983_v18, %v970_v10 }
  0x30   : > { %872 = vst [vmem:[%s1014_s25 + $0x38] sm:$0xff] %v797_v29   ;;  %v802_v3 = vpack.c.bf16 %v349_v30, %v348_v28  ;;  %v352_v34 = vmax.f32 %v316_v15, 0.0  ;;  %v353_v35 = vmax.f32 %v317_v16, 0.0  ;;  %v320_v4 = vadd.f32 %v983_v18, %v972_v11 }
  0x31   : > { %v807_v36 = vpack.c.bf16 %v351_v32, %v350_v31  ;;  %v354_v5 = vmax.f32 %v318_v33, 0.0  ;;  %v355_v37 = vmax.f32 %v319_v21, 0.0  ;;  %v321_v38 = vadd.f32 %v983_v18, %v974_v12 }
  0x32   : > { %873 = vst [vmem:[%s1014_s25 + $0x40] sm:$0xff] %v802_v3   ;;  %v812_v6 = vpack.c.bf16 %v353_v35, %v352_v34  ;;  %v356_v39 = vmax.f32 %v320_v4, 0.0  ;;  %v322_v10 = vadd.f32 %v983_v18, %v976_v13  ;;  %v323_v40 = vadd.f32 %v983_v18, %v978_v17 }
  0x33   : > { %874 = vst [vmem:[%s1014_s25 + $0x48] sm:$0xff] %v807_v36   ;;  %v817_v41 = vpack.c.bf16 %v355_v37, %v354_v5  ;;  %v357_v42 = vmax.f32 %v321_v38, 0.0  ;;  %v324_v11 = vadd.f32 %v983_v18, %v985_v19  ;;  %v325_v12 = vadd.f32 %v983_v18, %v987_v20 }
  0x34   : > { %875 = vst [vmem:[%s1014_s25 + $0x50] sm:$0xff] %v812_v6   ;;  %v358_v43 = vmax.f32 %v322_v10, 0.0  ;;  %v359_v44 = vmax.f32 %v323_v40, 0.0  ;;  %v326_v45 = vadd.f32 %v983_v18, %v989_v22  ;;  %v327_v13 = vadd.f32 %v983_v18, %v991_v23 }
  0x35   : > { %876 = vst [vmem:[%s1014_s25 + $0x58] sm:$0xff] %v817_v41   ;;  %v822_v17 = vpack.c.bf16 %v357_v42, %v356_v39  ;;  %v360_v46 = vmax.f32 %v324_v11, 0.0  ;;  %v361_v47 = vmax.f32 %v325_v12, 0.0  ;;  %v328_v19 = vadd.f32 %v983_v18, %v993_v24 }
  0x36   : > { %v827_v20 = vpack.c.bf16 %v359_v44, %v358_v43  ;;  %v362_v48 = vmax.f32 %v326_v45, 0.0  ;;  %v363_v49 = vmax.f32 %v327_v13, 0.0  ;;  %v329_v22 = vadd.f32 %v983_v18, %v995_v25 }
  0x37   : > { %877 = vst [vmem:[%s1014_s25 + $0x60] sm:$0xff] %v822_v17   ;;  %v832_v50 = vpack.c.bf16 %v361_v47, %v360_v46  ;;  %v364_v23 = vmax.f32 %v328_v19, 0.0  ;;  %v330_v51 = vadd.f32 %v983_v18, %v997_v26  ;;  %v331_v52 = vadd.f32 %v983_v18, %v999_v27 }
  0x38   : > { %878 = vst [vmem:[%s1014_s25 + $0x68] sm:$0xff] %v827_v20   ;;  %v837_v24 = vpack.c.bf16 %v363_v49, %v362_v48  ;;  %v365_v53 = vmax.f32 %v329_v22, 0.0 }
  0x39   : > { %879 = vst [vmem:[%s1014_s25 + $0x70] sm:$0xff] %v832_v50   ;;  %v366_v54 = vmax.f32 %v330_v51, 0.0  ;;  %v367_v55 = vmax.f32 %v331_v52, 0.0 }
  0x3a   : > { %880 = vst [vmem:[%s1014_s25 + $0x78] sm:$0xff] %v837_v24   ;;  %v842_v56 = vpack.c.bf16 %v365_v53, %v364_v23 }
  0x3b   : > { %v847_v57 = vpack.c.bf16 %v367_v55, %v366_v54 }
  0x3c   : > { %881 = vst [vmem:[%s1014_s25 + $0x80] sm:$0xff] %v842_v56  }
  0x3d   : > { %882 = vst [vmem:[%s1014_s25 + $0x88] sm:$0xff] %v847_v57  }
  0x3e PF: > { %s13_s12 = sadd.s32 1, %s897_s12  }
  0x3f   : > { %p10_p4 = scmp.ge.s32.totalorder %s13_s12, 4  }
  0x41   :  { %12 = sbr.rel (!%p10_p4) target bundleno = 1 (0x1), region = 62 }

// kernel: basic_conv2d.2
= control target key start
LH: loop header
LB: loop body
LE: loop exit
PB: predicated region body
PF: predicated region fallthrough
CT: control target
= control target key end

     0   :  { %s3690_s18 = smov 0   ;;  %s3692_s19 = smov 0   ;;  %s4044_s0 = inlined_call_operand.vmem [shape: bf16[3,576,4], index: 0, kind: input, shape index: {}]   ;;  %s4045_s1 = inlined_call_operand.vmem [shape: bf16[3,3,4,128], index: 1, kind: input, shape index: {}]   ;;  %s4046_s2 = inlined_call_operand.vmem [shape: f32[1,288], index: 2, kind: input, shape index: {}]   ;;  %s4047_s3 = inlined_call_operand.vmem [shape: bf16[576,128], index: 3, kind: output, shape index: {0}]   ;;  %s4048_s4 = inlined_call_operand.vmem [shape: f32[2,8,128], index: 4, kind: output, shape index: {1}]   ;;  %s4049_s5 = inlined_call_operand.vmem [shape: f32[2,8,128], index: 5, kind: output, shape index: {2}]  }
   0x1   :  { %s3694_s20 = smov 0   ;;  %s3696_s21 = smov 0  }
   0x2   :  { %s3698_s22 = smov 0  }
   0x3 LB: > { %s28_s23 = sadd.s32 1, %s3645_s20  ;;  %s35_s24 = sadd.s32 1, %s3649_s21  ;;  %s3653_s22 = sphi %s3698_s22, %s16_s22   ;;  %s3649_s21 = sphi %s3696_s21, %s4053_s21   ;;  %s3645_s20 = sphi %s3694_s20, %s4052_s20   ;;  %s3641_s19 = sphi %s3692_s19, %s4051_s19   ;;  %s3637_s18 = sphi %s3690_s18, %s4050_s18  }
   0x4   : > { %p29_p0 = scmp.ge.s32.totalorder %s28_s23, 3  ;;  %p2672_p1 = scmp.ge.s32.totalorder %s3653_s22, 1 }
   0x5   : > { %p234_p2 = scmp.lt.s32.totalorder %s3653_s22, 7 }
   0x6   : > { %s4055_s23 = smov (%p29_p0, %s28_s23), 0  ;;  %s4057_s24 = smov (!%p29_p0, %s35_s24), %s3649_s21 }
   0x7   : > { %p235_p3 = pnand %p2672_p1, %p234_p2  ;;  %p37_p4 = scmp.ge.s32.totalorder %s4057_s24, 2 }
   0x8   : > { %s282_s25 = smul.u32 (!%p235_p3), 36, %s3641_s19  ;;  %p283_p5 = scmp.lt.s32.totalorder (!%p235_p3), %s3637_s18, 2 }
   0x9   : > { %s4059_s24 = smov (%p37_p4, %s4057_s24), 0  ;;  %238 = sbr.rel (%p235_p3) target bundleno = 652 (0x28c), region = 32 }
   0xa   : > { %p316_p6 = scmp.eq.s32.totalorder (!%p235_p3), %s3637_s18, 0  ;;  %p285_p7 = scmp.lt.s32.totalorder (!%p235_p3), %s282_s25, 71 }
   0xb   : > { %p306_p8 = scmp.lt.s32.totalorder (!%p235_p3), %s3641_s19, 1 }
  0x10   : > { %s284_s26 = scalar_select %p283_p5, %s3637_s18, 2 }
  0x11   : > { %s4061_s25 = smov (!%p285_p7, %s282_s25), 71  ;;  %s4063_s19 = smov (!%p306_p8, %s3641_s19), 1 }
  0x12   : > { %s3514_s27 = smul.u32 72, %s284_s26  ;;  %s2675_s30 = sshll.u32 %s4061_s25, 2  ;;  %v3655_v0 = vmov (%p316_p6), 0.0  }
  0x13   : > { %s3515_s28 = smul.u32 6, %s284_s26  ;;  %s3742_s15 = scalar_lea.vmem %s4047_s3, %s2675_s30 }
  0x14   : > { %s288_s29 = sadd.s32 %s3514_s27, %s4061_s25  ;;  %s2676_s16 = sshll.u32 %s4063_s19, 3 }
  0x15   : > { %s2673_s6 = sshll.u32 %s288_s29, 2  ;;  %s3732_s9 = scalar_lea.vmem %s4045_s1, %s3515_s28 }
  0x16   : > { %s3737_s12 = scalar_lea.vmem %s4044_s0, %s2673_s6  ;;  %s3748_s26 = scalar_lea.vmem %s4048_s4, %s2676_s16 }
  0x17   : > { %s3753_s29 = scalar_lea.vmem %s4049_s5, %s2676_s16  ;;  %320 = sbr.rel (!%p316_p6) target bundleno = 30 (0x1e), region = 36  ;;  %321 = vst [vmem:[%s3748_s26] sm:$0xff] (%p316_p6), %v3655_v0 }
  0x18   : > { %322 = vst [vmem:[%s3753_s29] sm:$0xff] (%p316_p6), %v3655_v0 }
  0x1e PF: > { %p2679_p9 = scmp.ne.s32.totalorder %s3637_s18, 0 }
  0x1f   : > { %v3656_v1 = vmov (!%p2679_p9), 0.0  }
  0x20   : > { %325 = sbr.rel (%p2679_p9) target bundleno = 50 (0x32), region = 40  ;;  %326 = vst [vmem:[#allocation2] sm:$0xff] (!%p2679_p9), %v3656_v1  ;;  %327 = vst [vmem:[#allocation2 + $0x8] sm:$0xff] (!%p2679_p9), %v3656_v1 }
  0x21   : > { %328 = vst [vmem:[#allocation2 + $0x10] sm:$0xff] (!%p2679_p9), %v3656_v1  ;;  %329 = vst [vmem:[#allocation2 + $0x18] sm:$0xff] (!%p2679_p9), %v3656_v1 }
  0x22   : > { %330 = vst [vmem:[#allocation2 + $0x20] sm:$0xff] (!%p2679_p9), %v3656_v1  ;;  %331 = vst [vmem:[#allocation2 + $0x28] sm:$0xff] (!%p2679_p9), %v3656_v1 }
  0x23   : > { %332 = vst [vmem:[#allocation2 + $0x30] sm:$0xff] (!%p2679_p9), %v3656_v1  ;;  %333 = vst [vmem:[#allocation2 + $0x38] sm:$0xff] (!%p2679_p9), %v3656_v1 }
  0x24   : > { %334 = vst [vmem:[#allocation2 + $0x40] sm:$0xff] (!%p2679_p9), %v3656_v1  ;;  %335 = vst [vmem:[#allocation2 + $0x48] sm:$0xff] (!%p2679_p9), %v3656_v1 }
  0x25   : > { %336 = vst [vmem:[#allocation2 + $0x50] sm:$0xff] (!%p2679_p9), %v3656_v1  ;;  %337 = vst [vmem:[#allocation2 + $0x58] sm:$0xff] (!%p2679_p9), %v3656_v1 }
  0x26   : > { %338 = vst [vmem:[#allocation2 + $0x60] sm:$0xff] (!%p2679_p9), %v3656_v1  ;;  %339 = vst [vmem:[#allocation2 + $0x68] sm:$0xff] (!%p2679_p9), %v3656_v1 }
  0x27   : > { %340 = vst [vmem:[#allocation2 + $0x70] sm:$0xff] %v3656_v1  ;;  %341 = vst [vmem:[#allocation2 + $0x78] sm:$0xff] %v3656_v1 }
  0x28   : > { %342 = vst [vmem:[#allocation2 + $0x80] sm:$0xff] %v3656_v1  ;;  %343 = vst [vmem:[#allocation2 + $0x88] sm:$0xff] %v3656_v1 }
  0x29   : > { %344 = vst [vmem:[#allocation2 + $0x90] sm:$0xff] %v3656_v1  ;;  %345 = vst [vmem:[#allocation2 + $0x98] sm:$0xff] %v3656_v1 }
  0x2a   : > { %346 = vst [vmem:[#allocation2 + $0xa0] sm:$0xff] %v3656_v1  ;;  %347 = vst [vmem:[#allocation2 + $0xa8] sm:$0xff] %v3656_v1 }
  0x2b   : > { %348 = vst [vmem:[#allocation2 + $0xb0] sm:$0xff] %v3656_v1  ;;  %349 = vst [vmem:[#allocation2 + $0xb8] sm:$0xff] %v3656_v1 }
  0x2c   : > { %350 = vst [vmem:[#allocation2 + $0xc0] sm:$0xff] %v3656_v1  ;;  %351 = vst [vmem:[#allocation2 + $0xc8] sm:$0xff] %v3656_v1 }
  0x2d   : > { %352 = vst [vmem:[#allocation2 + $0xd0] sm:$0xff] %v3656_v1  ;;  %353 = vst [vmem:[#allocation2 + $0xd8] sm:$0xff] %v3656_v1 }
  0x2e   : > { %354 = vst [vmem:[#allocation2 + $0xe0] sm:$0xff] %v3656_v1  ;;  %355 = vst [vmem:[#allocation2 + $0xe8] sm:$0xff] %v3656_v1 }
  0x2f   : > { %356 = vst [vmem:[#allocation2 + $0xf0] sm:$0xff] %v3656_v1  ;;  %357 = vst [vmem:[#allocation2 + $0xf8] sm:$0xff] %v3656_v1 }
  0x30   : > { %358 = vst [vmem:[#allocation2 + $0x100] sm:$0xff] %v3656_v1  ;;  %359 = vst [vmem:[#allocation2 + $0x108] sm:$0xff] %v3656_v1 }
  0x31   : > { %360 = vst [vmem:[#allocation2 + $0x110] sm:$0xff] %v3656_v1  ;;  %361 = vst [vmem:[#allocation2 + $0x118] sm:$0xff] %v3656_v1 }
  0x32 PF: > { %v434_v2 = vld [vmem:[%s3732_s9] sm:$0x3]  ;;  %vm580_vm0 = vcmask 1041408   ;;  %vm525_vm1 = vcmask 31744   ;;  %v3562_v5 = vld [vmem:[%s3737_s12 + $0x8] sm:$0xff]   ;;  %v3565_v16 = vld [vmem:[%s3737_s12 + $0x10] sm:$0xff]  }
  0x33   : > { %v3561_v3 = vld [vmem:[%s3737_s12] sm:$0xff]   ;;  %3510 = vmatprep.subr.msk.bf16.mxu1 %vm580_vm0, %v434_v2  ;;  %v582_v4 = vsel %vm580_vm0, %v434_v2, 0  ;;  %v3564_v9 = vld [vmem:[%s3737_s12 + $0x8] sm:$0xff]   ;;  %vm997_vm2 = vsmask.f32 7424  ;;  %v3566_v17 = vld [vmem:[%s3737_s12 + $0x10] sm:$0xff]  }
  0x34   : > { %3113 = vmatpush3.bf16.msra.mxu1 %v582_v4  ;;  %3114 = vmatprep.mubr.msk.bf16.mxu1 %vm525_vm1, %v3561_v3  ;;  %v2716_v6 = vld [vmem:[%s3732_s9 + $0x2] sm:$0x3]  ;;  %v2753_v12 = vld [vmem:[%s3732_s9 + $0x4] sm:$0x3]  ;;  %v1006_v13 = vshll.u32 %v3564_v9, 16  ;;  %v1010_v14 = vshrl.u32 %v3564_v9, 16 }
  0x35   : > { %3511 = vmatprep.subr.msk.bf16.mxu0 %vm580_vm0, %v2716_v6  ;;  %v1196_v7 = vsel %vm580_vm0, %v2716_v6, 0  ;;  %3512 = vmatprep.subr.msk.bf16.mxu1 %vm580_vm0, %v2716_v6  ;;  %v3563_v8 = vld [vmem:[%s3737_s12] sm:$0xff]   ;;  %v3567_v19 = vld [vmem:[%s3737_s12 + $0x18] sm:$0xff]   ;;  %v1014_v21 = vshll.u32 %v3565_v16, 16  ;;  %v1018_v24 = vshrl.u32 %v3565_v16, 16  ;;  %v1702_v31 = vsel %vm580_vm0, %v2753_v12, 0 }
  0x36   : > { %3151 = vmatpush3.bf16.msra.mxu0 %v1196_v7  ;;  %v999_v10 = vshrl.u32 %v3563_v8, 16  ;;  %v1001_v11 = vshll.u32 %v3563_v8, 16  ;;  %v1008_v18 = vrot.slane %v1006_v13, 1  ;;  %v3568_v22 = vld [vmem:[%s3737_s12 + $0x18] sm:$0xff]   ;;  %v3569_v25 = vld [vmem:[%s3737_s12 + $0x20] sm:$0xff]   ;;  %v3572_v36 = vld [vmem:[%s3737_s12 + $0x28] sm:$0xff]  }
  0x37   : > { %3115 = vmatmul.mubr.msk.bf16.vlgmr.msra.gmra.mrb[0].mxu1 %vm525_vm1, %v3562_v5  ;;  %3513 = vmatprep.subr.msk.bf16.mxu0 %vm580_vm0, %v2753_v12  ;;  %v1016_v27 = vrot.slane %v1014_v21, 1  ;;  %v1022_v28 = vshll.u32 %v3568_v22, 16  ;;  %v1026_v29 = vshrl.u32 %v3568_v22, 16  ;;  %v3570_v30 = vld [vmem:[%s3737_s12 + $0x20] sm:$0xff]   ;;  %v1030_v32 = vshll.u32 %v3569_v25, 16  ;;  %v3573_v42 = vld [vmem:[%s3737_s12 + $0x30] sm:$0xff]  }
  0x38   : > { %3325 = vmatpush3.bf16.msra.mxu1 %v1196_v7  ;;  %v1003_v15 = vrot.slane %v1001_v11, 1  ;;  %3118 = vmatprep.mubr.msk.bf16.mxu1 %vm525_vm1, %v3566_v17  ;;  %v1012_v23 = vor.u32 %v1010_v14, %v1008_v18  ;;  %v1034_v38 = vshrl.u32 %v3569_v25, 16  ;;  %v1038_v41 = vshll.u32 %v3572_v36, 16  ;;  %v3571_v44 = vld [vmem:[%s3737_s12 + $0x28] sm:$0xff]   ;;  %v3574_v47 = vld [vmem:[%s3737_s12 + $0x30] sm:$0xff]   ;;  %v3576_v50 = vld [vmem:[%s3737_s12 + $0x38] sm:$0xff]  }
  0x39   : > { %v1020_v34 = vor.u32 %v1018_v24, %v1016_v27  ;;  %v1024_v35 = vrot.slane %v1022_v28, 1  ;;  %v1032_v37 = vrot.slane %v1030_v32, 1  ;;  %v1046_v46 = vshll.u32 %v3573_v42, 16  ;;  %v3577_v55 = vld [vmem:[%s3737_s12 + $0x40] sm:$0xff]   ;;  %v3580_v59 = vld [vmem:[%s3737_s12 + $0x48] sm:$0xff]   ;;  %v3575_v60 = vld [vmem:[%s3737_s12 + $0x38] sm:$0xff]  }
  0x3a   : > { %v1004_v20 = vor.u32 %v1003_v15, %v999_v10  ;;  %v1017_v33 = vsel %vm997_vm2, %v1012_v23, %v1016_v27  ;;  %v1040_v45 = vrot.slane %v1038_v41, 1  ;;  %v1042_v49 = vshrl.u32 %v3572_v36, 16  ;;  %v3578_v62 = vld [vmem:[%s3737_s12 + $0x40] sm:$0xff]   ;;  %v3581_v6 = vld [vmem:[%s3737_s12 + $0x50] sm:$0xff]   ;;  %v3579_v9 = vld [vmem:[%s3737_s12 + $0x48] sm:$0xff]   ;;  %p2790_p10 = scmp.ne.s32.totalorder %s3637_s18, 2 }
  0x3b   : > { %v1025_v39 = vsel %vm997_vm2, %v1020_v34, %v1024_v35  ;;  %v1028_v40 = vor.u32 %v1026_v29, %v1024_v35  ;;  %v1036_v43 = vor.u32 %v1034_v38, %v1032_v37  ;;  %v1050_v52 = vshrl.u32 %v3573_v42, 16  ;;  %v3582_v11 = vld [vmem:[%s3737_s12 + $0x50] sm:$0xff]   ;;  %v3585_v14 = vld [vmem:[%s3737_s12 + $0x8] sm:$0xff]   ;;  %v3584_v16 = vld [vmem:[%s3737_s12] sm:$0xfe]  }
  0x3c   : > { %v1009_v26 = vsel %vm997_vm2, %v1004_v20, %v1008_v18  ;;  %v1054_v53 = vshll.u32 %v3576_v50, 16  ;;  %v1048_v54 = vrot.slane %v1046_v46, 1  ;;  %v1044_v56 = vor.u32 %v1042_v49, %v1040_v45  ;;  %v3587_v22 = vld [vmem:[%s3737_s12 + $0x60] sm:$0xff]   ;;  %v3586_v24 = vld [vmem:[%s3737_s12 + $0x10] sm:$0xff]   ;;  %v3588_v29 = vld [vmem:[%s3737_s12 + $0x68] sm:$0xff]  }
  0x3d   : > { %3152 = vmatprep.mubr.msk.bf16.mxu0 %vm525_vm1, %v1009_v26  ;;  %v1033_v48 = vsel %vm997_vm2, %v1028_v40, %v1032_v37  ;;  %v1041_v51 = vsel %vm997_vm2, %v1036_v43, %v1040_v45  ;;  %v1062_v61 = vshll.u32 %v3577_v55, 16  ;;  %v1058_v0 = vshrl.u32 %v3576_v50, 16  ;;  %v3589_v26 = vld [vmem:[%s3737_s12 + $0x18] sm:$0xff]   ;;  %v3590_v32 = vld [vmem:[%s3737_s12 + $0x20] sm:$0xff]   ;;  %v3593_v34 = vld [vmem:[%s3737_s12 + $0x28] sm:$0xff]  }
  0x3e   : > { %3153 = vmatmul.mubr.msk.bf16.vlgmr.msra.gmra.mrb[0].mxu0 %vm525_vm1, %v1017_v33  ;;  %v1052_v57 = vor.u32 %v1050_v52, %v1048_v54  ;;  %v1056_v58 = vrot.slane %v1054_v53, 1  ;;  %v1049_v63 = vsel %vm997_vm2, %v1044_v56, %v1048_v54  ;;  %v1066_v2 = vshrl.u32 %v3577_v55, 16  ;;  %v3599_v36 = vld [vmem:[%s3737_s12 + $0x58] sm:$0xff]   ;;  %v3594_v42 = vld [vmem:[%s3737_s12 + $0x30] sm:$0xff]   ;;  %v3600_v46 = vld [vmem:[%s3737_s12 + $0x60] sm:$0xff]  }
  0x3f   : > { %3119 = vmatmul.mubr.msk.bf16.gmra.mrb[4].mxu1 %vm525_vm1, %v3567_v19  ;;  %3189 = vmatpush3.bf16.msra.mxu0 %v1702_v31  ;;  %v1070_v3 = vshll.u32 %v3580_v59, 16  ;;  %v1064_v4 = vrot.slane %v1062_v61, 1  ;;  %v1074_v10 = vshrl.u32 %v3580_v59, 16  ;;  %v1078_v13 = vshll.u32 %v3581_v6, 16  ;;  %v3583_v19 = vld [vmem:[%s3737_s12 + $0x58] sm:$0xff]   ;;  %v3603_v50 = vld [vmem:[%s3737_s12 + $0x68] sm:$0xff]  }
  0x40   : > { %3122 = vmatprep.mubr.msk.bf16.mxu1 %vm525_vm1, %v3570_v30  ;;  %3156 = vmatprep.mubr.msk.bf16.mxu0 %vm525_vm1, %v1025_v39  ;;  %v1057_v1 = vsel %vm997_vm2, %v1052_v57, %v1056_v58  ;;  %v1060_v5 = vor.u32 %v1058_v0, %v1056_v58  ;;  %vm1611_vm3 = vcmask 1046528   ;;  %v1612_v20 = vrot.slane %v3584_v16, 1  ;;  %v3591_v30 = vld [vmem:[%s3737_s12 + $0x70] sm:$0xff]   ;;  %v3592_v38 = vld [vmem:[%s3737_s12 + $0x78] sm:$0xff]   ;;  %v3595_v39 = vld [vmem:[%s3737_s12 + $0x80] sm:$0xff]  }
  0x41   : > { %v1068_v7 = vor.u32 %v1066_v2, %v1064_v4  ;;  %v1072_v8 = vrot.slane %v1070_v3, 1  ;;  %v1080_v18 = vrot.slane %v1078_v13, 1  ;;  %v1613_v21 = vrot.slane %v3585_v14, 1  ;;  %v3597_v45 = vld [vmem:[%s3737_s12 + $0x38] sm:$0xff]   ;;  %v3596_v52 = vld [vmem:[%s3737_s12 + $0x88] sm:$0x7f]  }
  0x42   : > { %v1065_v12 = vsel %vm997_vm2, %v1060_v5, %v1064_v4  ;;  %v1615_v27 = vrot.slane %v3586_v24, 1  ;;  %v1617_v28 = vrot.slane %v3589_v26, 1  ;;  %v1619_v35 = vrot.slane %v3590_v32, 1  ;;  %v3598_v56 = vld [vmem:[%s3737_s12 + $0x40] sm:$0xff]   ;;  %v3601_v61 = vld [vmem:[%s3737_s12 + $0x48] sm:$0xff]   ;;  %v3607_v4 = vld [vmem:[%s3737_s12 + $0x78] sm:$0xff]  }
  0x43   : > { %v1073_v15 = vsel %vm997_vm2, %v1068_v7, %v1072_v8  ;;  %v1076_v17 = vor.u32 %v1074_v10, %v1072_v8  ;;  %v1614_v25 = vsel %vm1611_vm3, %v1612_v20, %v1613_v21  ;;  %v1621_v37 = vrot.slane %v3593_v34, 1  ;;  %v3602_v10 = vld [vmem:[%s3737_s12 + $0x50] sm:$0xff]  }
  0x44   : > { %v1616_v31 = vsel %vm1611_vm3, %v1613_v21, %v1615_v27  ;;  %v1618_v33 = vsel %vm1611_vm3, %v1615_v27, %v1617_v28  ;;  %v1082_v40 = vshrl.u32 %v3581_v6, 16  ;;  %v1620_v41 = vsel %vm1611_vm3, %v1617_v28, %v1619_v35  ;;  %v3606_v28 = vld [vmem:[%s3737_s12 + $0x60] sm:$0xff]  }
  0x45   : > { %v1081_v23 = vsel %vm997_vm2, %v1076_v17, %v1080_v18  ;;  %v1086_v43 = vshll.u32 %v3599_v36, 16  ;;  %v1094_v53 = vshll.u32 %v3600_v46, 16  ;;  %v1090_v54 = vshrl.u32 %v3599_v36, 16  ;;  %v3608_v17 = vld [vmem:[%s3737_s12 + $0x80] sm:$0xff]  }
  0x46   : > { %3157 = vmatmul.mubr.msk.bf16.gmra.mrb[4].mxu0 %vm525_vm1, %v1033_v48  ;;  %v1084_v48 = vor.u32 %v1082_v40, %v1080_v18  ;;  %v1098_v58 = vshrl.u32 %v3600_v46, 16  ;;  %v1102_v59 = vshll.u32 %v3603_v50, 16  ;;  %v1629_v5 = vrot.slane %v3601_v61, 1 }
  0x47   : > { %3123 = vmatmul.mubr.msk.bf16.gmra.mrb[8].mxu1 %vm525_vm1, %v3571_v44  ;;  %3160 = vmatprep.mubr.msk.bf16.mxu0 %vm525_vm1, %v1041_v51  ;;  %v1622_v44 = vsel %vm1611_vm3, %v1619_v35, %v1621_v37  ;;  %v1088_v49 = vrot.slane %v1086_v43, 1  ;;  %v1625_v51 = vrot.slane %v3597_v45, 1  ;;  %v1106_v8 = vshrl.u32 %v3603_v50, 16  ;;  %v3612_v45 = vld [vmem:[%s3737_s12 + $0x78] sm:$0xff]  }
  0x48   : > { %3126 = vmatprep.mubr.msk.bf16.mxu1 %vm525_vm1, %v3574_v47  ;;  %v1623_v47 = vrot.slane %v3594_v42, 1  ;;  %v1104_v3 = vrot.slane %v1102_v59, 1  ;;  %v1118_v13 = vshll.u32 %v3607_v4, 16  ;;  %v1126_v24 = vshll.u32 %v3608_v17, 16  ;;  %v3610_v42 = vld [vmem:[%s3737_s12 + $0x70] sm:$0xff]  }
  0x49   : > { %v1089_v57 = vsel %vm997_vm2, %v1084_v48, %v1088_v49  ;;  %v1092_v0 = vor.u32 %v1090_v54, %v1088_v49  ;;  %v1122_v26 = vshrl.u32 %v3607_v4, 16  ;;  %v1635_v36 = vrot.slane %v3606_v28, 1 }
  0x4a   : > { %v1624_v55 = vsel %vm1611_vm3, %v1621_v37, %v1623_v47  ;;  %v1108_v18 = vor.u32 %v1106_v8, %v1104_v3  ;;  %v1120_v21 = vrot.slane %v1118_v13, 1  ;;  %v1128_v34 = vrot.slane %v1126_v24, 1 }
  0x4b   : > { %v1641_v48 = vrot.slane %v3612_v45, 1  ;;  %v372_v45 = vld [vmem:[#allocation2 + $0x50] sm:$0xff]  ;;  %vm3658_vm4 = vmmov (!%p2790_p10), 0   ;;  %vm2190_vm5 = vcmask (!%p2790_p10), 261120  }
  0x4c   : > { %v1124_v35 = vor.u32 %v1122_v26, %v1120_v21 }
  0x4e   : > { %3161 = vmatmul.mubr.msk.bf16.gmra.mrb[8].mxu0 %vm525_vm1, %v1049_v63  ;;  %v3604_v63 = vld [vmem:[%s3737_s12 + $0x70] sm:$0xff]   ;;  %v1129_v40 = vsel %vm997_vm2, %v1124_v35, %v1128_v34 }
  0x4f   : > { %3127 = vmatmul.mubr.msk.bf16.gmra.mrb[12].mxu1 %vm525_vm1, %v3575_v60  ;;  %3164 = vmatprep.mubr.msk.bf16.mxu0 %vm525_vm1, %v1057_v1  ;;  %v1626_v60 = vsel %vm1611_vm3, %v1623_v47, %v1625_v51  ;;  %v1627_v1 = vrot.slane %v3598_v56, 1  ;;  %v1110_v6 = vshll.u32 %v3604_v63, 16  ;;  %v1639_v47 = vrot.slane %v3610_v42, 1 }
  0x50   : > { %3130 = vmatprep.mubr.msk.bf16.mxu1 %vm525_vm1, %v3578_v62  ;;  %v1096_v62 = vrot.slane %v1094_v53, 1  ;;  %v3614_v53 = vld [vmem:[%s3737_s12 + $0x88] sm:$0xff]  }
  0x51   : > { %v1630_v14 = vsel %vm1611_vm3, %v1627_v1, %v1629_v5  ;;  %v1112_v16 = vrot.slane %v1110_v6, 1 }
  0x52   : > { %v1100_v2 = vor.u32 %v1098_v58, %v1096_v62  ;;  %v1097_v7 = vsel %vm997_vm2, %v1092_v0, %v1096_v62 }
  0x56   : > { %3165 = vmatmul.mubr.msk.bf16.gmra.mrb[12].mxu0 %vm525_vm1, %v1065_v12  ;;  %v1114_v12 = vshrl.u32 %v3604_v63, 16 }
  0x57   : > { %3131 = vmatmul.mubr.msk.bf16.gmra.mrb[16].mxu1 %vm525_vm1, %v3579_v9  ;;  %3168 = vmatprep.mubr.msk.bf16.mxu0 %vm525_vm1, %v1073_v15  ;;  %v1628_v9 = vsel %vm1611_vm3, %v1625_v51, %v1627_v1  ;;  %v3605_v15 = vld [vmem:[%s3737_s12 + $0x58] sm:$0xff]   ;;  %v3613_v51 = vld [vmem:[%s3737_s12 + $0x80] sm:$0xff]  }
  0x58   : > { %3134 = vmatprep.mubr.msk.bf16.mxu1 %vm525_vm1, %v3582_v11  ;;  %v1105_v11 = vsel %vm997_vm2, %v1100_v2, %v1104_v3  ;;  %v1116_v20 = vor.u32 %v1114_v12, %v1112_v16  ;;  %v1643_v54 = vrot.slane %v3613_v51, 1 }
  0x5a   : > { %v1644_v56 = vsel %vm1611_vm3, %v1641_v48, %v1643_v54 }
  0x5e   : > { %3169 = vmatmul.mubr.msk.bf16.gmra.mrb[16].mxu0 %vm525_vm1, %v1081_v23  ;;  %v1633_v23 = vrot.slane %v3605_v15, 1  ;;  %v362_v15 = vld [vmem:[#allocation2] sm:$0xff] }
  0x5f   : > { %3135 = vmatmul.mubr.msk.bf16.gmra.mrb[20].mxu1 %vm525_vm1, %v3583_v19  ;;  %3190 = vmatprep.mubr.msk.bf16.mxu0 %vm525_vm1, %v1614_v25  ;;  %v1631_v19 = vrot.slane %v3602_v10, 1  ;;  %v1113_v25 = vsel %vm997_vm2, %v1108_v18, %v1112_v16  ;;  %v365_v16 = vld [vmem:[#allocation2 + $0x18] sm:$0xff]  ;;  %v363_v18 = vld [vmem:[#allocation2 + $0x8] sm:$0xff] }
  0x60   : > { %3138 = vmatprep.mubr.msk.bf16.mxu1 %vm525_vm1, %v3587_v22  ;;  %v3611_v22 = vld [vmem:[%s3737_s12 + $0x88] sm:$0xff]  }
  0x61   : > { %v1632_v27 = vsel %vm1611_vm3, %v1629_v5, %v1631_v19  ;;  %v1634_v32 = vsel %vm1611_vm3, %v1631_v19, %v1633_v23  ;;  %v1138_v46 = vshrl.u32 %v3611_v22, 16 }
  0x66   : > { %3191 = vmatmul.mubr.msk.bf16.vlgmr.msra.gmra.mrb[0].mxu0 %vm525_vm1, %v1616_v31  ;;  %v1134_v31 = vshll.u32 %v3611_v22, 16 }
  0x67   : > { %3139 = vmatmul.mubr.msk.bf16.gmra.mrb[24].mxu1 %vm525_vm1, %v3588_v29  ;;  %3194 = vmatprep.mubr.msk.bf16.mxu0 %vm525_vm1, %v1618_v33  ;;  %v1121_v29 = vsel %vm997_vm2, %v1116_v20, %v1120_v21  ;;  %v3609_v33 = vld [vmem:[%s3737_s12 + $0x68] sm:$0xff]  }
  0x68   : > { %3142 = vmatprep.mubr.msk.bf16.mxu1 %vm525_vm1, %v3591_v30  ;;  %v1130_v30 = vshrl.u32 %v3608_v17, 16 }
  0x6a   : > { %v1132_v37 = vor.u32 %v1130_v30, %v1128_v34  ;;  %v367_v34 = vld [vmem:[#allocation2 + $0x28] sm:$0xff] }
  0x6e   : > { %3195 = vmatmul.mubr.msk.bf16.gmra.mrb[4].mxu0 %vm525_vm1, %v1620_v41  ;;  %v1636_v41 = vsel %vm1611_vm3, %v1633_v23, %v1635_v36 }
  0x6f   : > { %3143 = vmatmul.mubr.msk.bf16.gmra.mrb[28].mxu1 %vm525_vm1, %v3592_v38  ;;  %3198 = vmatprep.mubr.msk.bf16.mxu0 %vm525_vm1, %v1622_v44  ;;  %v1136_v38 = vrot.slane %v1134_v31, 1  ;;  %v366_v31 = vld [vmem:[#allocation2 + $0x20] sm:$0xff] }
  0x70   : > { %3146 = vmatprep.mubr.msk.bf16.mxu1 %vm525_vm1, %v3595_v39  ;;  %v1637_v39 = vrot.slane %v3609_v33, 1 }
  0x71   : > { %v1137_v43 = vsel %vm997_vm2, %v1132_v37, %v1136_v38  ;;  %v1140_v49 = vor.u32 %v1138_v46, %v1136_v38 }
  0x72   : > { %v1638_v44 = vsel %vm1611_vm3, %v1635_v36, %v1637_v39  ;;  %v1640_v50 = vsel %vm1611_vm3, %v1637_v39, %v1639_v47 }
  0x76   : > { %3199 = vmatmul.mubr.msk.bf16.gmra.mrb[8].mxu0 %vm525_vm1, %v1624_v55  ;;  %v1645_v55 = vrot.slane %v3614_v53, 1 }
  0x77   : > { %3147 = vmatmul.mubr.msk.bf16.gmra.mrb[32].mxu1 %vm525_vm1, %v3596_v52  ;;  %3202 = vmatprep.mubr.msk.bf16.mxu0 %vm525_vm1, %v1626_v60  ;;  %v1642_v52 = vsel %vm1611_vm3, %v1639_v47, %v1641_v48  ;;  %v370_v47 = vld [vmem:[#allocation2 + $0x40] sm:$0xff]  ;;  %v373_v48 = vld [vmem:[#allocation2 + $0x58] sm:$0xff] }
  0x78   : > { %3172 = vmatprep.mubr.msk.bf16.mxu1 %vm525_vm1, %v1089_v57  ;;  %v1646_v57 = vsel %vm1611_vm3, %v1643_v54, %v1645_v55 }
  0x7e   : > { %3203 = vmatmul.mubr.msk.bf16.gmra.mrb[12].mxu0 %vm525_vm1, %v1628_v9 }
  0x7f   : > { %3173 = vmatmul.mubr.msk.bf16.vlgmr.msra.gmra.mrb[20].mxu1 %vm525_vm1, %v1097_v7  ;;  %3206 = vmatprep.mubr.msk.bf16.mxu0 %vm525_vm1, %v1630_v14  ;;  %v364_v14 = vld [vmem:[#allocation2 + $0x10] sm:$0xff] }
  0x80   : > { %3176 = vmatprep.mubr.msk.bf16.mxu1 %vm525_vm1, %v1105_v11 }
  0x86   : > { %3207 = vmatmul.mubr.msk.bf16.gmra.mrb[16].mxu0 %vm525_vm1, %v1632_v27 }
  0x87   : > { %3177 = vmatmul.mubr.msk.bf16.gmra.mrb[24].mxu1 %vm525_vm1, %v1113_v25  ;;  %3210 = vmatprep.mubr.msk.bf16.mxu0 %vm525_vm1, %v1634_v32  ;;  %v369_v32 = vld [vmem:[#allocation2 + $0x38] sm:$0xff] }
  0x88   : > { %3180 = vmatprep.mubr.msk.bf16.mxu1 %vm525_vm1, %v1121_v29  ;;  %v368_v29 = vld [vmem:[#allocation2 + $0x30] sm:$0xff] }
  0x8e   : > { %3211 = vmatmul.mubr.msk.bf16.gmra.mrb[20].mxu0 %vm525_vm1, %v1636_v41 }
  0x8f   : > { %3181 = vmatmul.mubr.msk.bf16.gmra.mrb[28].mxu1 %vm525_vm1, %v1129_v40  ;;  %3214 = vmatprep.mubr.msk.bf16.mxu0 %vm525_vm1, %v1638_v44 }
  0x90   : > { %3184 = vmatprep.mubr.msk.bf16.mxu1 %vm525_vm1, %v1137_v43 }
  0x96   : > { %3215 = vmatmul.mubr.msk.bf16.gmra.mrb[24].mxu0 %vm525_vm1, %v1640_v50  ;;  %v371_v50 = vld [vmem:[#allocation2 + $0x48] sm:$0xff] }
  0x97   : > { %3185 = vmatmul.mubr.msk.bf16.gmra.mrb[36].mxu1 %vm525_vm1, %v1140_v49  ;;  %3218 = vmatprep.mubr.msk.bf16.mxu0 %vm525_vm1, %v1642_v52  ;;  %v397_v52 = vld [vmem:[#allocation2 + $0x118] sm:$0x3f] }
  0x9e   : > { %3219 = vmatmul.mubr.msk.bf16.gmra.mrb[28].mxu0 %vm525_vm1, %v1644_v56 }
  0x9f   : > { %3222 = vmatprep.mubr.msk.bf16.mxu0 %vm525_vm1, %v1646_v57 }
  0xa6   : > { %3223 = vmatmul.mubr.msk.bf16.gmra.mrb[32].mxu0 %vm525_vm1, %v1645_v55 }
 0x10a   : > { %v3116_v58 = vpop.f32.mrb[0].mxu1 }
 0x10b   : > { %v618_v59 = vpop.f32.mrb[1].mxu1  ;;  %v763_v17 = vadd.f32 %v3116_v58, %v364_v14  ;;  %v376_v14 = vld [vmem:[#allocation2 + $0x70] sm:$0xff] }
 0x10c   : > { %v3117_v60 = vpop.f32.mrb[2].mxu1  ;;  %v761_v19 = vadd.f32 %v618_v59, %v362_v15  ;;  %v374_v15 = vld [vmem:[#allocation2 + $0x60] sm:$0xff] }
 0x10d   : > { %v621_v61 = vpop.f32.mrb[3].mxu1  ;;  %v764_v21 = vadd.f32 %v3117_v60, %v365_v16 }
 0x10e   : > { %v762_v24 = vadd.f32 %v621_v61, %v363_v18 }
 0x112   : > { %v3120_v62 = vpop.f32.mrb[4].mxu1 }
 0x113   : > { %v634_v63 = vpop.f32.mrb[5].mxu1  ;;  %v767_v33 = vadd.f32 %v3120_v62, %v368_v29 }
 0x114   : > { %v3121_v0 = vpop.f32.mrb[6].mxu1  ;;  %v765_v35 = vadd.f32 %v634_v63, %v366_v31 }
 0x115   : > { %v637_v1 = vpop.f32.mrb[7].mxu1  ;;  %v768_v37 = vadd.f32 %v3121_v0, %v369_v32  ;;  %v378_v32 = vld [vmem:[#allocation2 + $0x80] sm:$0xff] }
 0x116   : > { %v766_v40 = vadd.f32 %v637_v1, %v367_v34 }
 0x11a   : > { %v3124_v2 = vpop.f32.mrb[8].mxu1 }
 0x11b   : > { %v650_v3 = vpop.f32.mrb[9].mxu1  ;;  %v771_v49 = vadd.f32 %v3124_v2, %v372_v45 }
 0x11c   : > { %v3125_v4 = vpop.f32.mrb[10].mxu1  ;;  %v769_v53 = vadd.f32 %v650_v3, %v370_v47 }
 0x11d   : > { %v3912_v5 = vpop.f32.mrb[11].mxu1  ;;  %v772_v56 = vadd.f32 %v3125_v4, %v373_v48  ;;  %v377_v4 = vld [vmem:[#allocation2 + $0x78] sm:$0xff]  ;;  %v382_v48 = vld [vmem:[#allocation2 + $0xa0] sm:$0xff] }
 0x11e   : > { %v770_v60 = vadd.f32 %v3912_v5, %v371_v50 }
 0x122   : > { %v3914_v6 = vpop.f32.mrb[12].mxu1 }
 0x123   : > { %v3916_v7 = vpop.f32.mrb[13].mxu1  ;;  %v775_v16 = vadd.f32 %v3914_v6, %v376_v14  ;;  %v380_v6 = vld [vmem:[#allocation2 + $0x90] sm:$0xff]  ;;  %v394_v14 = vld [vmem:[#allocation2 + $0x100] sm:$0xff] }
 0x124   : > { %v3918_v8 = vpop.f32.mrb[14].mxu1  ;;  %v773_v18 = vadd.f32 %v3916_v7, %v374_v15  ;;  %v381_v7 = vld [vmem:[#allocation2 + $0x98] sm:$0xff] }
 0x125   : > { %v3920_v9 = vpop.f32.mrb[15].mxu1 }
 0x12a   : > { %v3922_v10 = vpop.f32.mrb[16].mxu1 }
 0x12b   : > { %v3924_v11 = vpop.f32.mrb[17].mxu1 }
 0x12c   : > { %v3926_v12 = vpop.f32.mrb[18].mxu1 }
 0x12d   : > { %v3928_v13 = vpop.f32.mrb[19].mxu1 }
 0x139   : > { %v3192_v20 = vpop.f32.mrb[0].mxu0 }
 0x13a   : > { %v3329_v22 = vadd.f32 %v3192_v20, %v763_v17  ;;  %v1738_v23 = vpop.f32.mrb[1].mxu0  ;;  %v375_v17 = vld [vmem:[#allocation2 + $0x68] sm:$0xff] }
 0x13b   : > { %v3333_v25 = vadd.f32 %v1738_v23, %v761_v19  ;;  %v3193_v26 = vpop.f32.mrb[2].mxu0 }
 0x13c   : > { %1919 = vst [vmem:[#allocation2 + $0x10] sm:$0xff] %v3329_v22  ;;  %v3337_v27 = vadd.f32 %v3193_v26, %v764_v21  ;;  %v1741_v28 = vpop.f32.mrb[3].mxu0  ;;  %v776_v21 = vadd.f32 %v3918_v8, %v377_v4  ;;  %v779_v8 = vadd.f32 %v3922_v10, %v380_v6  ;;  %v384_v10 = vld [vmem:[#allocation2 + $0xb0] sm:$0xff]  ;;  %v386_v4 = vld [vmem:[#allocation2 + $0xc0] sm:$0xff] }
 0x13d   : > { %1917 = vst [vmem:[#allocation2] sm:$0xff] %v3333_v25  ;;  %v3341_v30 = vadd.f32 %v1741_v28, %v762_v24  ;;  %v774_v25 = vadd.f32 %v3920_v9, %v375_v17  ;;  %v395_v17 = vld [vmem:[#allocation2 + $0x108] sm:$0xff] }
 0x13e   : > { %1920 = vst [vmem:[#allocation2 + $0x18] sm:$0xff] %v3337_v27 }
 0x13f   : > { %1918 = vst [vmem:[#allocation2 + $0x8] sm:$0xff] %v3341_v30 }
 0x141   : > { %v3196_v36 = vpop.f32.mrb[4].mxu0 }
 0x142   : > { %v3345_v38 = vadd.f32 %v3196_v36, %v767_v33  ;;  %v1754_v39 = vpop.f32.mrb[5].mxu0  ;;  %v379_v33 = vld [vmem:[#allocation2 + $0x88] sm:$0xff] }
 0x143   : > { %v3349_v41 = vadd.f32 %v1754_v39, %v765_v35  ;;  %v3197_v42 = vpop.f32.mrb[6].mxu0  ;;  %v777_v35 = vadd.f32 %v3924_v11, %v378_v32  ;;  %v385_v11 = vld [vmem:[#allocation2 + $0xb8] sm:$0xff] }
 0x144   : > { %1923 = vst [vmem:[#allocation2 + $0x30] sm:$0xff] %v3345_v38  ;;  %v3353_v43 = vadd.f32 %v3197_v42, %v768_v37  ;;  %v1757_v44 = vpop.f32.mrb[7].mxu0  ;;  %v780_v37 = vadd.f32 %v3926_v12, %v381_v7  ;;  %v383_v12 = vld [vmem:[#allocation2 + $0xa8] sm:$0xff] }
 0x145   : > { %1921 = vst [vmem:[#allocation2 + $0x20] sm:$0xff] %v3349_v41  ;;  %v3357_v46 = vadd.f32 %v1757_v44, %v766_v40  ;;  %v778_v41 = vadd.f32 %v3928_v13, %v379_v33 }
 0x146   : > { %1924 = vst [vmem:[#allocation2 + $0x38] sm:$0xff] %v3353_v43 }
 0x147   : > { %1922 = vst [vmem:[#allocation2 + $0x28] sm:$0xff] %v3357_v46 }
 0x149   : > { %v3200_v54 = vpop.f32.mrb[8].mxu0 }
 0x14a   : > { %v3930_v51 = vpop.f32.mrb[32].mxu1  ;;  %v3361_v57 = vadd.f32 %v3200_v54, %v771_v49  ;;  %v1770_v58 = vpop.f32.mrb[9].mxu0 }
 0x14b   : > { %v3932_v55 = vpop.f32.mrb[33].mxu1  ;;  %v3365_v61 = vadd.f32 %v1770_v58, %v769_v53  ;;  %v3201_v62 = vpop.f32.mrb[10].mxu0 }
 0x14c   : > { %v3149_v59 = vpop.f32.mrb[34].mxu1  ;;  %1927 = vst [vmem:[#allocation2 + $0x50] sm:$0xff] %v3361_v57  ;;  %v3369_v1 = vadd.f32 %v3201_v62, %v772_v56  ;;  %v1773_v2 = vpop.f32.mrb[11].mxu0 }
 0x14d   : > { %v796_v63 = vadd.f32 %v3149_v59, %v397_v52  ;;  %v3935_v0 = vpop.f32.mrb[35].mxu1  ;;  %1925 = vst [vmem:[#allocation2 + $0x40] sm:$0xff] %v3365_v61  ;;  %v3373_v3 = vadd.f32 %v1773_v2, %v770_v60 }
 0x14e   : > { %1928 = vst [vmem:[#allocation2 + $0x58] sm:$0xff] %v3369_v1 }
 0x14f   : > { %832 = vst [vmem:[#allocation2 + $0x118] sm:$0x3f] %v796_v63  ;;  %1926 = vst [vmem:[#allocation2 + $0x48] sm:$0xff] %v3373_v3  ;;  %v396_v63 = vld [vmem:[#allocation2 + $0x110] sm:$0xff] }
 0x150   : > { %v388_v3 = vld [vmem:[#allocation2 + $0xd0] sm:$0xff] }
 0x151   : > { %v3204_v19 = vpop.f32.mrb[12].mxu0 }
 0x152   : > { %v3174_v5 = vpop.f32.mrb[20].mxu1  ;;  %v3377_v22 = vadd.f32 %v3204_v19, %v775_v16  ;;  %v1786_v23 = vpop.f32.mrb[13].mxu0  ;;  %v795_v16 = vadd.f32 %v3930_v51, %v396_v63 }
 0x153   : > { %v1312_v20 = vpop.f32.mrb[21].mxu1  ;;  %v3381_v26 = vadd.f32 %v1786_v23, %v773_v18  ;;  %v3205_v27 = vpop.f32.mrb[14].mxu0  ;;  %v3408_v49 = vadd.f32 %v3174_v5, %v384_v10  ;;  %v389_v5 = vld [vmem:[#allocation2 + $0xd8] sm:$0xff]  ;;  %v793_v18 = vadd.f32 %v3932_v55, %v394_v14  ;;  %v1958_v14 = vld [vmem:[#allocation2 + $0x8] sm:$0xff] (!%p2790_p10) }
 0x154   : > { %v3175_v24 = vpop.f32.mrb[22].mxu1  ;;  %1931 = vst [vmem:[#allocation2 + $0x70] sm:$0xff] %v3377_v22  ;;  %v3385_v29 = vadd.f32 %v3205_v27, %v776_v21  ;;  %v1789_v30 = vpop.f32.mrb[15].mxu0  ;;  %v3414_v52 = vadd.f32 %v1312_v20, %v382_v48  ;;  %v387_v20 = vld [vmem:[#allocation2 + $0xc8] sm:$0xff] }
 0x155   : > { %v1315_v28 = vpop.f32.mrb[23].mxu1  ;;  %1929 = vst [vmem:[#allocation2 + $0x60] sm:$0xff] %v3381_v26  ;;  %v3389_v31 = vadd.f32 %v1789_v30, %v774_v25  ;;  %v3420_v13 = vadd.f32 %v3175_v24, %v385_v11  ;;  %v794_v26 = vadd.f32 %v3935_v0, %v395_v17  ;;  %v390_v0 = vld [vmem:[#allocation2 + $0xe0] sm:$0xff] }
 0x156   : > { %1932 = vst [vmem:[#allocation2 + $0x78] sm:$0xff] %v3385_v29  ;;  %v3426_v59 = vadd.f32 %v1315_v28, %v383_v12  ;;  %v868_v6 = vld [vmem:[#allocation2 + $0x118] sm:$0x3f] }
 0x157   : > { %1930 = vst [vmem:[#allocation2 + $0x68] sm:$0xff] %v3389_v31 }
 0x159   : > { %v3208_v9 = vpop.f32.mrb[16].mxu0 }
 0x15a   : > { %v3178_v34 = vpop.f32.mrb[24].mxu1  ;;  %v3393_v38 = vadd.f32 %v3208_v9, %v779_v8  ;;  %v1802_v39 = vpop.f32.mrb[17].mxu0  ;;  %v392_v9 = vld [vmem:[#allocation2 + $0xf0] sm:$0xff] }
 0x15b   : > { %v1328_v36 = vpop.f32.mrb[25].mxu1  ;;  %v3397_v42 = vadd.f32 %v1802_v39, %v777_v35  ;;  %v3209_v43 = vpop.f32.mrb[18].mxu0  ;;  %v3432_v19 = vadd.f32 %v3178_v34, %v388_v3  ;;  %v391_v39 = vld [vmem:[#allocation2 + $0xe8] sm:$0xff] }
 0x15c   : > { %v3179_v40 = vpop.f32.mrb[26].mxu1  ;;  %1935 = vst [vmem:[#allocation2 + $0x90] sm:$0xff] %v3393_v38  ;;  %v3401_v45 = vadd.f32 %v3209_v43, %v780_v37  ;;  %v1805_v46 = vpop.f32.mrb[19].mxu0  ;;  %v3438_v22 = vadd.f32 %v1328_v36, %v386_v4  ;;  %v393_v37 = vld [vmem:[#allocation2 + $0xf8] sm:$0xff] }
 0x15d   : > { %v1331_v44 = vpop.f32.mrb[27].mxu1  ;;  %1933 = vst [vmem:[#allocation2 + $0x80] sm:$0xff] %v3397_v42  ;;  %v3405_v47 = vadd.f32 %v1805_v46, %v778_v41  ;;  %v3444_v27 = vadd.f32 %v3179_v40, %v389_v5 }
 0x15e   : > { %1936 = vst [vmem:[#allocation2 + $0x98] sm:$0xff] %v3401_v45  ;;  %v3450_v31 = vadd.f32 %v1331_v44, %v387_v20 }
 0x15f   : > { %1934 = vst [vmem:[#allocation2 + $0x88] sm:$0xff] %v3405_v47 }
 0x161   : > { %v3212_v53 = vpop.f32.mrb[20].mxu0 }
 0x162   : > { %v3182_v50 = vpop.f32.mrb[28].mxu1  ;;  %v3411_v56 = vadd.f32 %v3408_v49, %v3212_v53  ;;  %v1818_v57 = vpop.f32.mrb[21].mxu0 }
 0x163   : > { %v1344_v54 = vpop.f32.mrb[29].mxu1  ;;  %v3417_v60 = vadd.f32 %v3414_v52, %v1818_v57  ;;  %v3213_v61 = vpop.f32.mrb[22].mxu0  ;;  %v3456_v38 = vadd.f32 %v3182_v50, %v392_v9  ;;  %v1975_v17 = vld [vmem:[#allocation2 + $0x90] sm:$0xff] (!%p2790_p10)  ;;  %v1964_v9 = vld [vmem:[#allocation2 + $0x38] sm:$0xff] (!%p2790_p10) }
 0x164   : > { %v3183_v58 = vpop.f32.mrb[30].mxu1  ;;  %1939 = vst [vmem:[#allocation2 + $0xb0] sm:$0xff] %v3411_v56  ;;  %v3423_v1 = vadd.f32 %v3420_v13, %v3213_v61  ;;  %v1821_v2 = vpop.f32.mrb[23].mxu0  ;;  %v3462_v40 = vadd.f32 %v1344_v54, %v390_v0  ;;  %v2176_v61 = vlaneseq (!%p2790_p10) }
 0x165   : > { %v1347_v62 = vpop.f32.mrb[31].mxu1  ;;  %1937 = vst [vmem:[#allocation2 + $0xa0] sm:$0xff] %v3417_v60  ;;  %v3429_v15 = vadd.f32 %v3426_v59, %v1821_v2  ;;  %v3468_v42 = vadd.f32 %v3183_v58, %v393_v37  ;;  %v1973_v58 = vld [vmem:[#allocation2 + $0x80] sm:$0xff] (!%p2790_p10)  ;;  %v1976_v5 = vld [vmem:[#allocation2 + $0x98] sm:$0xff] (!%p2790_p10) }
 0x166   : > { %1940 = vst [vmem:[#allocation2 + $0xb8] sm:$0xff] %v3423_v1  ;;  %v3474_v45 = vadd.f32 %v1347_v62, %v391_v39  ;;  %v1974_v59 = vld [vmem:[#allocation2 + $0x88] sm:$0xff] (!%p2790_p10)  ;;  %v3657_v62 = vmov (!%p2790_p10), 0.0|0.0   ;;  %v1957_v2 = vld [vmem:[#allocation2] sm:$0xff] (!%p2790_p10)  ;;  %v2352_v3 = vmul.f32 (!%p2790_p10), %v1973_v58, %v1973_v58 }
 0x167   : > { %1938 = vst [vmem:[#allocation2 + $0xa8] sm:$0xff] %v3429_v15  ;;  %3280 = vmatprep.subr.bf16.mxu1 (!%p2790_p10), %v3657_v62  ;;  %v2911_v63 = vpack.c.bf16 (!%p2790_p10), %v1974_v59, %v1973_v58  ;;  %v2353_v15 = vmul.f32 (!%p2790_p10), %v1974_v59, %v1974_v59  ;;  %v3961_v20 = vmul.f32 (!%p2790_p10), %v1957_v2, %v1957_v2 }
 0x169   : > { %v3216_v23 = vpop.f32.mrb[24].mxu0  ;;  %2965 = vst [vmem:[%s3742_s15 + $0x40] sm:$0xff] (!%p2790_p10), %v2911_v63   ;;  %3249 = vmatprep.subr.bf16.mxu0 (!%p2790_p10), %v2911_v63  ;;  %v1969_v63 = vld [vmem:[#allocation2 + $0x60] sm:$0xff] (!%p2790_p10) }
 0x16a   : > { %v3186_v21 = vpop.f32.mrb[36].mxu1  ;;  %v3435_v28 = vadd.f32 %v3432_v19, %v3216_v23  ;;  %v1834_v29 = vpop.f32.mrb[25].mxu0  ;;  %v3659_v19 = vmov (!%p2790_p10), 0.0  }
 0x16b   : > { %v1409_v24 = vadd.f32 %v3186_v21, %v795_v16  ;;  %v1360_v25 = vpop.f32.mrb[37].mxu1  ;;  %v3441_v32 = vadd.f32 %v3438_v22, %v1834_v29  ;;  %v3217_v7 = vpop.f32.mrb[26].mxu0  ;;  %v2871_v16 = vpack.c.bf16 (!%p2790_p10), %v1958_v14, %v1957_v2  ;;  %3234 = vmatprep.mubr.msk.f32.mxu1 (!%p2790_p10), %vm3658_vm4, %v3659_v19  ;;  %v3963_v21 = vmul.f32 (!%p2790_p10), %v1958_v14, %v1958_v14  ;;  %v1970_v2 = vld [vmem:[#allocation2 + $0x68] sm:$0xff] (!%p2790_p10) }
 0x16c   : > { %v1407_v30 = vadd.f32 %v1360_v25, %v793_v18  ;;  %v3187_v51 = vpop.f32.mrb[38].mxu1  ;;  %1943 = vst [vmem:[#allocation2 + $0xd0] sm:$0xff] %v3435_v28  ;;  %v3447_v33 = vadd.f32 %v3444_v27, %v3217_v7  ;;  %v1837_v34 = vpop.f32.mrb[27].mxu0  ;;  %v2916_v22 = vpack.c.bf16 (!%p2790_p10), %v1976_v5, %v1975_v17  ;;  %v1960_v25 = vld [vmem:[#allocation2 + $0x18] sm:$0xff] (!%p2790_p10)  ;;  %v3976_v28 = vld [vmem:[%s4046_s2] sm:$0x7] (!%p2790_p10) }
 0x16d   : > { %v1410_v8 = vadd.f32 %v3187_v51, %v868_v6  ;;  %v1363_v55 = vpop.f32.mrb[39].mxu1  ;;  %1941 = vst [vmem:[#allocation2 + $0xc0] sm:$0xff] %v3441_v32  ;;  %v3453_v36 = vadd.f32 %v3450_v31, %v1837_v34  ;;  %2872 = vst [vmem:[%s3742_s15] sm:$0xff] (!%p2790_p10), %v2871_v16   ;;  %3251 = vmatpush3.bf16.msra.mxu0 (!%p2790_p10), %v2871_v16  ;;  %v1977_v29 = vld [vmem:[#allocation2 + $0xa0] sm:$0xff] (!%p2790_p10)  ;;  %v1962_v32 = vld [vmem:[#allocation2 + $0x28] sm:$0xff] (!%p2790_p10) }
 0x16e   : > { %v1408_v35 = vadd.f32 %v1363_v55, %v794_v26  ;;  %1944 = vst [vmem:[#allocation2 + $0xd8] sm:$0xff] %v3447_v33  ;;  %v3967_v26 = vshrl.u32 (!%p2790_p10), %v2176_v61, 7  ;;  %2966 = vst [vmem:[%s3742_s15 + $0x48] sm:$0xff] (!%p2790_p10), %v2916_v22   ;;  %3253 = vmatprep.subr.bf16.mxu0 (!%p2790_p10), %v2916_v22  ;;  %v1961_v31 = vld [vmem:[#allocation2 + $0x20] sm:$0xff] (!%p2790_p10)  ;;  %v1979_v7 = vld [vmem:[#allocation2 + $0xb0] sm:$0xff] (!%p2790_p10) }
 0x16f   : > { %1446 = vst [vmem:[#allocation2 + $0x118] sm:$0x3f] %v1410_v8  ;;  %1942 = vst [vmem:[#allocation2 + $0xc8] sm:$0xff] %v3453_v36  ;;  %v3286_v8 = vpack.c.bf16 (!%p2790_p10), %v2353_v15, %v2352_v3  ;;  %v2881_v33 = vpack.c.bf16 (!%p2790_p10), %v1962_v32, %v1961_v31  ;;  %v1980_v34 = vld [vmem:[#allocation2 + $0xb8] sm:$0xff] (!%p2790_p10)  ;;  %v3288_v36 = vpack.c.bf16 (!%p2790_p10), %v3963_v21, %v3961_v20  ;;  %v1971_v21 = vld [vmem:[#allocation2 + $0x70] sm:$0xff] (!%p2790_p10) }
 0x170   : > { %v2186_v51 = vsub.s32 (!%p2790_p10), 2, %v3967_v26  ;;  %v2358_v58 = vmul.f32 (!%p2790_p10), %v1979_v7, %v1979_v7  ;;  %v2359_v59 = vmul.f32 (!%p2790_p10), %v1980_v34, %v1980_v34  ;;  %v2901_v20 = vpack.c.bf16 (!%p2790_p10), %v1970_v2, %v1969_v63  ;;  %v1972_v22 = vld [vmem:[#allocation2 + $0x78] sm:$0xff] (!%p2790_p10) }
 0x171   : > { %v3220_v41 = vpop.f32.mrb[28].mxu0  ;;  %2959 = vst [vmem:[%s3742_s15 + $0x10] sm:$0xff] (!%p2790_p10), %v2881_v33  }
 0x172   : > { %v3459_v43 = vadd.f32 %v3456_v38, %v3220_v41  ;;  %v1850_v44 = vpop.f32.mrb[29].mxu0  ;;  %v3986_v37 = vrot.slane (!%p2790_p10), %v3976_v28, %v2186_v51  ;;  %v2354_v38 = vmul.f32 (!%p2790_p10), %v1975_v17, %v1975_v17  ;;  %v2339_v41 = vmul.f32 (!%p2790_p10), %v1960_v25, %v1960_v25  ;;  %2963 = vst [vmem:[%s3742_s15 + $0x30] sm:$0xff] (!%p2790_p10), %v2901_v20  }
 0x173   : > { %v3465_v46 = vadd.f32 %v3462_v40, %v1850_v44  ;;  %v3221_v10 = vpop.f32.mrb[30].mxu0  ;;  %v1965_v44 = vld [vmem:[#allocation2 + $0x40] sm:$0xff] (!%p2790_p10) }
 0x174   : > { %1947 = vst [vmem:[#allocation2 + $0xf0] sm:$0xff] %v3459_v43  ;;  %v3471_v47 = vadd.f32 %v3468_v42, %v3221_v10  ;;  %v1853_v48 = vpop.f32.mrb[31].mxu0  ;;  %v1981_v39 = vld [vmem:[#allocation2 + $0xc0] sm:$0xff] (!%p2790_p10)  ;;  %v2355_v42 = vmul.f32 (!%p2790_p10), %v1976_v5, %v1976_v5  ;;  %v2926_v43 = vpack.c.bf16 (!%p2790_p10), %v1980_v34, %v1979_v7  ;;  %v3990_v10 = vld [vmem:[#allocation2 + $0xd0] sm:$0xff] (!%p2790_p10)  ;;  %v2344_v7 = vmul.f32 (!%p2790_p10), %v1965_v44, %v1965_v44 }
 0x175   : > { %1945 = vst [vmem:[#allocation2 + $0xe0] sm:$0xff] %v3465_v46  ;;  %v3477_v11 = vadd.f32 %v3474_v45, %v1853_v48  ;;  %v1966_v45 = vld [vmem:[#allocation2 + $0x48] sm:$0xff] (!%p2790_p10)  ;;  %v2356_v48 = vmul.f32 (!%p2790_p10), %v1977_v29, %v1977_v29  ;;  %v2362_v34 = vmul.f32 (!%p2790_p10), %v3990_v10, %v3990_v10 }
 0x176   : > { %1948 = vst [vmem:[#allocation2 + $0xf8] sm:$0xff] %v3471_v47  ;;  %v1482_v53 = vld [vmem:[#allocation2 + $0x118] sm:$0x3f]  ;;  %v1982_v40 = vld [vmem:[#allocation2 + $0xc8] sm:$0xff] (!%p2790_p10)  ;;  %v3290_v47 = vpack.c.bf16 (!%p2790_p10), %v2355_v42, %v2354_v38  ;;  %2968 = vst [vmem:[%s3742_s15 + $0x58] sm:$0xff] (!%p2790_p10), %v2926_v43  }
 0x177   : > { %1946 = vst [vmem:[#allocation2 + $0xe8] sm:$0xff] %v3477_v11 }
 0x179   : > { %v3224_v49 = vpop.f32.mrb[32].mxu0  ;;  %1956 = sbr.rel (%p2790_p10) target bundleno = 652 (0x28c), region = 44 }
 0x17a   : > { %v1915_v12 = vadd.f32 %v3224_v49, %v1409_v24  ;;  %v1866_v52 = vpop.f32.mrb[33].mxu0  ;;  %v1959_v24 = vld [vmem:[#allocation2 + $0x10] sm:$0xff] (!%p2790_p10)  ;;  %v2931_v49 = vpack.c.bf16 (!%p2790_p10), %v1982_v40, %v1981_v39 }
 0x17b   : > { %v1913_v50 = vadd.f32 %v1866_v52, %v1407_v30  ;;  %v3225_v54 = vpop.f32.mrb[34].mxu0  ;;  %v1978_v30 = vld [vmem:[#allocation2 + $0xa8] sm:$0xff] (!%p2790_p10)  ;;  %v2876_v6 = vpack.c.bf16 (!%p2790_p10), %v1960_v25, %v1959_v24  ;;  %v2338_v0 = vmul.f32 (!%p2790_p10), %v1959_v24, %v1959_v24  ;;  %v1967_v52 = vld [vmem:[#allocation2 + $0x50] sm:$0xff] (!%p2790_p10)  ;;  %v2182_v24 = vsub.s32 (!%p2790_p10), 1, %v3967_v26 }
 0x17c   : > { %1951 = vst [vmem:[#allocation2 + $0x110] sm:$0xff] %v1915_v12  ;;  %v1916_v13 = vadd.f32 %v3225_v54, %v1482_v53  ;;  %v1869_v56 = vpop.f32.mrb[35].mxu0  ;;  %v2921_v55 = vpack.c.bf16 (!%p2790_p10), %v1978_v30, %v1977_v29  ;;  %v2357_v11 = vmul.f32 (!%p2790_p10), %v1978_v30, %v1978_v30  ;;  %v1984_v12 = vld [vmem:[#allocation2 + $0xd8] sm:$0xff] (!%p2790_p10)  ;;  %v2340_v53 = vmul.f32 (!%p2790_p10), %v1961_v31, %v1961_v31 }
 0x17d   : > { %1949 = vst [vmem:[#allocation2 + $0x100] sm:$0xff] %v1913_v50  ;;  %v1914_v57 = vadd.f32 %v1869_v56, %v1408_v35  ;;  %v1963_v35 = vld [vmem:[#allocation2 + $0x30] sm:$0xff] (!%p2790_p10)  ;;  %2958 = vst [vmem:[%s3742_s15 + $0x8] sm:$0xff] (!%p2790_p10), %v2876_v6   ;;  %3255 = vmatpush3.bf16.msra.mxu0 (!%p2790_p10), %v2876_v6  ;;  %v1968_v50 = vld [vmem:[#allocation2 + $0x58] sm:$0xff] (!%p2790_p10)  ;;  %v2341_v54 = vmul.f32 (!%p2790_p10), %v1962_v32, %v1962_v32  ;;  %v2936_v3 = vpack.c.bf16 (!%p2790_p10), %v1984_v12, %v3990_v10 }
 0x17e   : > { %1952 = vst [vmem:[#allocation2 + $0x118] sm:$0x3f] %v1916_v13  ;;  %2967 = vst [vmem:[%s3742_s15 + $0x50] sm:$0xff] (!%p2790_p10), %v2921_v55   ;;  %3257 = vmatprep.subr.bf16.mxu0 (!%p2790_p10), %v2921_v55  ;;  %v2886_v46 = vpack.c.bf16 (!%p2790_p10), %v1964_v9, %v1963_v35  ;;  %v2891_v13 = vpack.c.bf16 (!%p2790_p10), %v1966_v45, %v1965_v44  ;;  %v1985_v56 = vld [vmem:[#allocation2 + $0xe0] sm:$0xff] (!%p2790_p10)  ;;  %v1986_v61 = vld [vmem:[#allocation2 + $0xe8] sm:$0xff] (!%p2790_p10)  ;;  %v3294_v14 = vpack.c.bf16 (!%p2790_p10), %v2357_v11, %v2356_v48 }
 0x17f   : > { %1950 = vst [vmem:[#allocation2 + $0x108] sm:$0xff] %v1914_v57  ;;  %v3292_v57 = vpack.c.bf16 (!%p2790_p10), %v2339_v41, %v2338_v0  ;;  %2969 = vst [vmem:[%s3742_s15 + $0x60] sm:$0xff] (!%p2790_p10), %v2931_v49   ;;  %v2896_v15 = vpack.c.bf16 (!%p2790_p10), %v1968_v50, %v1967_v52  ;;  %v1988_v16 = vld [vmem:[#allocation2 + $0xf8] sm:$0xff] (!%p2790_p10)  ;;  %v2342_v17 = vmul.f32 (!%p2790_p10), %v1963_v35, %v1963_v35 }
 0x180   : > { %2960 = vst [vmem:[%s3742_s15 + $0x18] sm:$0xff] %v2886_v46   ;;  %2961 = vst [vmem:[%s3742_s15 + $0x20] sm:$0xff] %v2891_v13   ;;  %v2941_v5 = vpack.c.bf16 %v1986_v61, %v1985_v56  ;;  %v2343_v25 = vmul.f32 %v1964_v9, %v1964_v9  ;;  %v3298_v29 = vpack.c.bf16 %v2359_v59, %v2358_v58 }
 0x181   : > { %3259 = vmatpush3.bf16.msra.mxu0 %v2881_v33  ;;  %2970 = vst [vmem:[%s3742_s15 + $0x68] sm:$0xff] %v2936_v3   ;;  %2962 = vst [vmem:[%s3742_s15 + $0x28] sm:$0xff] %v2896_v15   ;;  %v2360_v30 = vmul.f32 %v1981_v39, %v1981_v39  ;;  %v2361_v6 = vmul.f32 %v1982_v40, %v1982_v40  ;;  %v2906_v31 = vpack.c.bf16 %v1972_v22, %v1971_v21 }
 0x182   : > { %3261 = vmatprep.subr.bf16.mxu0 %v2926_v43  ;;  %2971 = vst [vmem:[%s3742_s15 + $0x70] sm:$0xff] %v2941_v5   ;;  %v2183_v32 = vrot.slane %v3976_v28, %v2182_v24  ;;  %v3300_v55 = vpack.c.bf16 %v2343_v25, %v2342_v17  ;;  %v2363_v35 = vmul.f32 %v1984_v12, %v1984_v12  ;;  %v2178_v43 = vsub.s32 0, %v3967_v26 }
 0x183   : > { %v3956_v18 = vld [vmem:[#allocation2 + $0x110] sm:$0xff]  ;;  %2964 = vst [vmem:[%s3742_s15 + $0x38] sm:$0xff] %v2906_v31   ;;  %v3302_v33 = vpack.c.bf16 %v2361_v6, %v2360_v30  ;;  %v2346_v9 = vmul.f32 %v1967_v52, %v1967_v52  ;;  %v2364_v39 = vmul.f32 %v1985_v56, %v1985_v56  ;;  %v2365_v40 = vmul.f32 %v1986_v61, %v1986_v61 }
 0x184   : > { %v3949_v60 = vld [vmem:[#allocation2 + $0x100] sm:$0xff]  ;;  %2257 = vmatprep.mubr.f32.mxu0 %v2183_v32  ;;  %v3306_v38 = vpack.c.bf16 %v2363_v35, %v2362_v34  ;;  %v2348_v44 = vmul.f32 %v1969_v63, %v1969_v63  ;;  %v2367_v48 = vmul.f32 %v1988_v16, %v1988_v16  ;;  %v2350_v26 = vmul.f32 %v1971_v21, %v1971_v21 }
 0x185   : > { %v3965_v23 = vld [vmem:[#allocation2 + $0x118] sm:$0xff]  ;;  %3263 = vmatpush3.bf16.msra.mxu0 %v2886_v46  ;;  %v2368_v41 = vmul.f32 %v3949_v60, %v3949_v60  ;;  %v3310_v10 = vpack.c.bf16 %v2365_v40, %v2364_v39  ;;  %v2351_v12 = vmul.f32 %v1972_v22, %v1972_v22 }
 0x186   : > { %v3952_v1 = vld [vmem:[#allocation2 + $0x108] sm:$0xff]  ;;  %v2956_v27 = vpack.c.bf16 %v3965_v23, %v3956_v18  ;;  %3265 = vmatprep.subr.bf16.mxu0 %v2931_v49  ;;  %v2370_v49 = vmul.f32 %v3956_v18, %v3956_v18 }
 0x187   : > { %v2951_v4 = vpack.c.bf16 %v3952_v1, %v3949_v60  ;;  %v2369_v42 = vmul.f32 %v3952_v1, %v3952_v1  ;;  %v2371_v60 = vmul.f32 %v3965_v23, %v3965_v23  ;;  %v2179_v1 = vrot.slane %v3976_v28, %v2178_v43 }
 0x188   : > { %2974 = vst [vmem:[%s3742_s15 + $0x88] sm:$0xff] %v2956_v27  }
 0x189   : > { %2973 = vst [vmem:[%s3742_s15 + $0x80] sm:$0xff] %v2951_v4   ;;  %3282 = vmatpush3.bf16.msra.mxu1 %v2951_v4  ;;  %v1987_v4 = vld [vmem:[#allocation2 + $0xf0] sm:$0xff]  ;;  %3267 = vmatpush3.bf16.msra.mxu0 %v2891_v13  ;;  %v3319_v11 = vpack.c.bf16 %v2369_v42, %v2368_v41  ;;  %v3322_v18 = vpack.c.bf16 %v2371_v60, %v2370_v49 }
 0x18a   : > { %3283 = vmatprep.subr.bf16.mxu1 %v3657_v62  ;;  %v2946_v51 = vpack.c.bf16 %v1988_v16, %v1987_v4  ;;  %3269 = vmatprep.subr.bf16.mxu0 %v2936_v3 }
 0x18c   : > { %2972 = vst [vmem:[%s3742_s15 + $0x78] sm:$0xff] %v2946_v51  }
 0x18d   : > { %3285 = vmatpush3.bf16.msra.mxu1 %v2956_v27  ;;  %v3296_v27 = vpack.c.bf16 %v2341_v54, %v2340_v53  ;;  %3271 = vmatpush3.bf16.msra.mxu0 %v2896_v15  ;;  %v3316_v53 = vpack.c.bf16 %v2351_v12, %v2350_v26 }
 0x18e   : > { %3287 = vmatprep.subr.bf16.mxu1 %v3286_v8  ;;  %v2345_v8 = vmul.f32 %v1966_v45, %v1966_v45  ;;  %3273 = vmatprep.subr.bf16.mxu0 %v2941_v5  ;;  %v2349_v45 = vmul.f32 %v1970_v2, %v1970_v2 }
 0x190   : > { %3235 = vmatmul.mubr.msk.f32.vlgmr.msra.gmra.mrb[0].mxu1 %vm2190_vm5, %v3986_v37  ;;  %v3304_v0 = vpack.c.bf16 %v2345_v8, %v2344_v7  ;;  %v3312_v52 = vpack.c.bf16 %v2349_v45, %v2348_v44 }
 0x191   : > { %3289 = vmatpush3.bf16.msra.mxu1 %v3288_v36  ;;  %2436 = vmatprep.mubr.f32.mxu1 %v2183_v32  ;;  %v2347_v36 = vmul.f32 %v1968_v50, %v1968_v50 }
 0x192   : > { %3291 = vmatprep.subr.bf16.mxu1 %v3290_v47  ;;  %3275 = vmatpush3.bf16.msra.mxu0 %v2901_v20  ;;  %v2366_v47 = vmul.f32 %v1987_v4, %v1987_v4 }
 0x193   : > { %v3308_v46 = vpack.c.bf16 %v2347_v36, %v2346_v9  ;;  %3277 = vmatprep.subr.bf16.mxu0 %v2946_v51 }
 0x194   : > { %v3314_v50 = vpack.c.bf16 %v2367_v48, %v2366_v47 }
 0x195   : > { %3293 = vmatpush3.bf16.msra.mxu1 %v3292_v57  ;;  %v2174_v57 = vld [vmem:[%s3748_s26] sm:$0x1] }
 0x196   : > { %3295 = vmatprep.subr.bf16.mxu1 %v3294_v14  ;;  %3279 = vmatpush3.bf16.msra.mxu0 %v2906_v31  ;;  %v2335_v14 = vld [vmem:[%s3753_s29] sm:$0x1] }
 0x197   : > { %3318 = vmatprep.subr.bf16.mxu0 %v3657_v62 }
 0x199   : > { %3297 = vmatpush3.bf16.msra.mxu1 %v3296_v27  ;;  %2258 = vmatmul.mubr.f32.vlgmr.msra.gmra.mrb[0].mxu0 %v2179_v1 }
 0x19a   : > { %3299 = vmatprep.subr.bf16.mxu1 %v3298_v29  ;;  %3320 = vmatpush3.bf16.msra.mxu0 %v3319_v11 }
 0x19b   : > { %3321 = vmatprep.subr.bf16.mxu0 %v3657_v62  ;;  %3245 = vmatprep.mubr.msk.f32.mxu0 %vm3658_vm4, %v3659_v19 }
 0x19d   : > { %3301 = vmatpush3.bf16.msra.mxu1 %v3300_v55 }
 0x19e   : > { %3303 = vmatprep.subr.bf16.mxu1 %v3302_v33  ;;  %3323 = vmatpush3.bf16.msra.mxu0 %v3322_v18 }
 0x1a1   : > { %3305 = vmatpush3.bf16.msra.mxu1 %v3304_v0  ;;  %3246 = vmatmul.mubr.msk.f32.vlgmr.msra.gmra.mrb[2].mxu0 %vm2190_vm5, %v3986_v37 }
 0x1a2   : > { %3307 = vmatprep.subr.bf16.mxu1 %v3306_v38 }
 0x1a5   : > { %3309 = vmatpush3.bf16.msra.mxu1 %v3308_v46 }
 0x1a6   : > { %3311 = vmatprep.subr.bf16.mxu1 %v3310_v10 }
 0x1a9   : > { %3313 = vmatpush3.bf16.msra.mxu1 %v3312_v52 }
 0x1aa   : > { %3315 = vmatprep.subr.bf16.mxu1 %v3314_v50 }
 0x1ad   : > { %3317 = vmatpush3.bf16.msra.mxu1 %v3316_v53 }
 0x1b0   : > { %2437 = vmatmul.mubr.f32.vlgmr.msra.gmra.mrb[2].mxu1 %v2179_v1 }
 0x263   : > { %v2329_v23 = vpop.f32.mrb[0].mxu1 }
 0x264   : > { %v3236_v28 = vpop.f32.mrb[1].mxu1 }
 0x26c   : > { %v3064_v54 = vpop.f32.mrb[0].mxu0 }
 0x26d   : > { %v3065_v13 = vpop.f32.mrb[1].mxu0 }
 0x26e   : > { %v3066_v56 = vadd.f32 %v3065_v13, %v3064_v54 }
 0x270   : > { %v2330_v58 = vadd.f32 %v3066_v56, %v2329_v23 }
 0x272   : > { %v2333_v59 = vadd.f32 %v2330_v58, %v2174_v57 }
 0x274   : > { %2334 = vst [vmem:[%s3748_s26] sm:$0x1] %v2333_v59  ;;  %v2508_v61 = vpop.f32.mrb[2].mxu0 }
 0x275   : > { %v3247_v63 = vpop.f32.mrb[3].mxu0 }
 0x283   : > { %v3104_v62 = vpop.f32.mrb[2].mxu1 }
 0x284   : > { %v3105_v19 = vpop.f32.mrb[3].mxu1 }
 0x285   : > { %v3106_v2 = vadd.f32 %v3105_v19, %v3104_v62 }
 0x287   : > { %v2509_v3 = vadd.f32 %v3106_v2, %v2508_v61 }
 0x289   : > { %v2512_v15 = vadd.f32 %v2509_v3, %v2335_v14 }
 0x28b   : > { %2513 = vst [vmem:[%s3753_s29] sm:$0x1] %v2512_v15 }
 0x28c PF: > { %s16_s22 = sadd.s32 1, %s3653_s22   ;;  %s4050_s18 = smov %s3645_s20 }
 0x28d   : > { %p13_p11 = scmp.ge.s32.totalorder %s16_s22, 8   ;;  %s4051_s19 = smov %s3649_s21 }
 0x28e   : > { %s4052_s20 = smov %s4055_s23  ;;  %s4053_s21 = smov %s4059_s24 }
 0x28f   :  { %15 = sbr.rel (!%p13_p11) target bundleno = 3 (0x3), region = 103 }

</bundles_post_ra>
